<compile_context>
chip_gen: v7x
topology: tpu7x:2x2x1
jax: 0.10.0
libtpu: 0.0.40
codegen_flags: <defaults>
</compile_context>

<pallas_src>
import numpy as np
import jax
import jax.numpy as jnp
from jax.experimental import pallas as pl
from jax.experimental.pallas import tpu as pltpu


# ----------------------------------------------------------------------------
# Kernels
# ----------------------------------------------------------------------------
def _finalize_lane_dense(r, out_ref):
    # r: (TR, 128) f32 whose columns 0..2 are [s, wx, wy].
    # Write (2, TR) lane-dense: row 0 = wx/s, row 1 = wy/s.
    rt = r.T                       # (128, TR): tile-aligned XLU transpose
    inv = 1.0 / rt[0:1, :]         # exact divide (tolerance): (1, TR)
    out_ref[...] = rt[1:3, :] * inv


def _spatial_softmax_kernel_mxu(f_ref, p_ref, out_ref):
    # f_ref:   (TR, HW) feature rows (native dtype)
    # p_ref:   (HW, 128) resident [ones | pos_x | pos_y | zeros] matrix (f32)
    # out_ref: (2, TR)  lane-dense [expected_x; expected_y]
    f = f_ref[...].astype(jnp.float32)
    m = jnp.max(f, axis=-1, keepdims=True)       # XLU row-max
    e = jnp.exp(f - m)                           # EUP; unnormalized softmax
    # One MXU matmul replaces 3 cross-lane reductions + 2 broadcast multiplies.
    r = jnp.dot(e, p_ref[...],
                preferred_element_type=jnp.float32,
                precision=jax.lax.Precision.HIGHEST)   # (TR, 128): [s, wx, wy, 0..]
    _finalize_lane_dense(r, out_ref)


def _spatial_softmax_kernel_vpu(f_ref, pos_ref, out_ref):
    # Fallback for very large HW (resident P matrix would not fit VMEM).
    # f_ref:   (TR, HW) feature rows
    # pos_ref: (2, HW)  resident [pos_x; pos_y] buffer (f32)
    # out_ref: (TR, 2)  [expected_x, expected_y] per row
    f = f_ref[...].astype(jnp.float32)
    m = jnp.max(f, axis=-1, keepdims=True)
    e = jnp.exp(f - m)
    px = pos_ref[0:1, :]
    py = pos_ref[1:2, :]
    s = jnp.sum(e, axis=-1, keepdims=True)
    wx = jnp.sum(e * px, axis=-1, keepdims=True)
    wy = jnp.sum(e * py, axis=-1, keepdims=True)
    inv = 1.0 / s
    out_ref[:, 0:1] = wx * inv
    out_ref[:, 1:2] = wy * inv


# ----------------------------------------------------------------------------
# Helpers
# ----------------------------------------------------------------------------
def make_pos_buffers(height, width):
    # Exactly mirrors the PyTorch module's buffer construction
    # (np.meshgrid(linspace(height), linspace(width)) then flat reshape).
    pos_x, pos_y = np.meshgrid(np.linspace(-1.0, 1.0, height),
                               np.linspace(-1.0, 1.0, width))
    pos_x = pos_x.reshape(height * width).astype(np.float32)
    pos_y = pos_y.reshape(height * width).astype(np.float32)
    return jnp.asarray(pos_x), jnp.asarray(pos_y)


def _round_up(x, m):
    return ((x + m - 1) // m) * m


def _round_down(x, m):
    return (x // m) * m


def _vmem_capacity_bytes():
    try:
        cap = getattr(pltpu.get_tpu_info(), "vmem_capacity_bytes", None)
        if cap:
            return int(cap)
    except Exception:
        pass
    return 64 * 1024 * 1024  # conservative (v7x-sized) default


def _choose_row_tile(rows, hw, itemsize, work_budget_bytes):
    # Per tile row working set: double-buffered native-dtype feature stream
    # (2*itemsize bytes/elem) plus ~3 live f32 intermediates (f, e, products).
    per_row = hw * (2 * itemsize + 12)
    by_vmem = work_budget_bytes // max(1, per_row)
    # Keep >= ~8 grid steps when the row count allows so v7x's two TensorCores
    # both get work and double-buffering has steps to hide the feature DMA.
    by_steps = max(256, _round_down(rows // 8, 128))
    tr = min(by_vmem, by_steps, 4096)
    tr = max(128, _round_down(tr, 128))    # lane-dense output needs TR % 128 == 0
    tr = min(tr, _round_up(rows, 128))     # never pad more than one tile of rows
    return tr


# Resident P matrix costs HW*512 B; beyond this fall back to the VPU kernel.
_MXU_POS_BYTES_LIMIT = 4 * 1024 * 1024


# ----------------------------------------------------------------------------
# Wrapper
# ----------------------------------------------------------------------------
def spatial_softmax(feature, pos_x, pos_y):
    """feature: (N, C, H, W) float -> (N, 2*C) float32 (matches PyTorch forward)."""
    N, C, H, W = feature.shape
    HW = H * W
    R = N * C

    f2 = feature.reshape(R, HW)               # native dtype; cast in-kernel
    itemsize = jnp.dtype(f2.dtype).itemsize

    # Generation-aware VMEM sizing (v7x: 64 MiB/TC, v5e/v6e: 128 MiB).
    vmem_cap = _vmem_capacity_bytes()
    if vmem_cap <= 64 * 1024 * 1024:
        work_budget, vmem_limit = 20 * 1024 * 1024, 48 * 1024 * 1024
    else:
        work_budget, vmem_limit = 32 * 1024 * 1024, 64 * 1024 * 1024

    TR = _choose_row_tile(R, HW, itemsize, work_budget)
    R_pad = pl.cdiv(R, TR) * TR
    if R_pad != R:
        f2 = jnp.pad(f2, ((0, R_pad - R), (0, 0)))   # zero rows: finite, sliced off

    px = pos_x.reshape(HW).astype(jnp.float32)
    py = pos_y.reshape(HW).astype(jnp.float32)

    grid = (R_pad // TR,)
    f_spec = pl.BlockSpec((TR, HW), lambda i: (i, 0))     # streamed feature rows
    cparams = pltpu.CompilerParams(
        dimension_semantics=("parallel",),                # megacore-shardable rows
        vmem_limit_bytes=vmem_limit,
    )

    use_mxu = HW * 128 * 4 <= _MXU_POS_BYTES_LIMIT
    if use_mxu:
        # Resident P = [ones | pos_x | pos_y | zeros]: one MXU matmul yields
        # s, wx, wy for the whole tile; output is lane-dense (2, R_pad).
        pmat = jnp.concatenate(
            [jnp.ones((HW, 1), jnp.float32), px[:, None], py[:, None],
             jnp.zeros((HW, 125), jnp.float32)], axis=1)   # (HW, 128)
        out = pl.pallas_call(
            _spatial_softmax_kernel_mxu,
            out_shape=jax.ShapeDtypeStruct((2, R_pad), jnp.float32),
            grid=grid,
            in_specs=[f_spec, pl.BlockSpec((HW, 128), lambda i: (0, 0))],
            out_specs=pl.BlockSpec((2, TR), lambda i: (0, i)),
            compiler_params=cparams,
        )(f2, pmat)
        out = out[:, :R].reshape(2, N, C)                  # drop row padding
        expected_x, expected_y = out[0], out[1]
    else:
        # Huge-HW fallback: VPU/XLU reductions; (R,2) output stores are a
        # negligible fraction of the per-row work at this size.
        pos2 = jnp.stack([px, py], axis=0)                 # (2, HW)
        out = pl.pallas_call(
            _spatial_softmax_kernel_vpu,
            out_shape=jax.ShapeDtypeStruct((R_pad, 2), jnp.float32),
            grid=grid,
            in_specs=[f_spec, pl.BlockSpec((2, HW), lambda i: (0, 0))],
            out_specs=pl.BlockSpec((TR, 2), lambda i: (i, 0)),
            compiler_params=cparams,
        )(f2, pos2)
        exy = out[:R].reshape(N, C, 2)
        expected_x, expected_y = exy[..., 0], exy[..., 1]

    return jnp.concatenate([expected_x, expected_y], axis=1)   # (N, 2*C)


def spatial_softmax_ref(feature, pos_x, pos_y):
    # Pure-JAX reference mirroring the PyTorch forward.
    N, C, H, W = feature.shape
    f = feature.reshape(N, C, H * W).astype(jnp.float32)
    att = jax.nn.softmax(f, axis=-1)
    ex = jnp.sum(pos_x[None, None, :] * att, axis=2)
    ey = jnp.sum(pos_y[None, None, :] * att, axis=2)
    return jnp.concatenate([ex, ey], axis=1)


if __name__ == "__main__":
    N, C, H, W = 2, 4, 16, 16
    key = jax.random.PRNGKey(0)
    feature = jax.random.normal(key, (N, C, H, W), dtype=jnp.float32)

    pos_x, pos_y = make_pos_buffers(H, W)

    out = spatial_softmax(feature, pos_x, pos_y)
    out = jax.block_until_ready(out)

    ref = spatial_softmax_ref(feature, pos_x, pos_y)
    assert out.shape == (N, 2 * C)
    assert jnp.allclose(out, ref, atol=1e-5, rtol=1e-5)

    print("KERNEL_OK")
</pallas_src>

<mosaic_0001>
module attributes {stable_mosaic.version = 11 : i64} {
  func.func @_spatial_softmax_kernel_mxu(%arg0: i32, %arg1: memref<128x256xf32, #tpu.memory_space<vmem>>, %arg2: memref<256x128xf32, #tpu.memory_space<vmem>>, %arg3: memref<2x128xf32, #tpu.memory_space<vmem>>) attributes {dimension_semantics = [#tpu.dimension_semantics<parallel>], iteration_bounds = array<i64: 1>, scalar_prefetch = 0 : i64, scratch_operands = 0 : i64, tpu.core_type = #tpu.core_type<tc>, window_params = [{transform_indices = @transform_0, window_bounds = array<i64: 128, 256>}, {pipeline_mode = #tpu.pipeline_mode<synchronous>, transform_indices = @transform_1, window_bounds = array<i64: 256, 128>}, {transform_indices = @transform_2, window_bounds = array<i64: 2, 128>}]} {
    %c0 = arith.constant 0 : index
    %c0_0 = arith.constant 0 : index
    %0 = vector.load %arg1[%c0, %c0_0] : memref<128x256xf32, #tpu.memory_space<vmem>>, vector<128x256xf32>
    %cst = arith.constant dense<0xFF800000> : vector<128xf32>
    %1 = vector.multi_reduction <maximumf>, %0, %cst [1] : vector<128x256xf32> to vector<128xf32>
    %2 = vector.shape_cast %1 : vector<128xf32> to vector<128x1xf32>
    %3 = vector.broadcast %2 : vector<128x1xf32> to vector<128x256xf32>
    %4 = arith.subf %0, %3 : vector<128x256xf32>
    %5 = math.exp %4 : vector<128x256xf32>
    %c0_1 = arith.constant 0 : index
    %c0_2 = arith.constant 0 : index
    %6 = vector.load %arg2[%c0_1, %c0_2] : memref<256x128xf32, #tpu.memory_space<vmem>>, vector<256x128xf32>
    %cst_3 = arith.constant dense<0.000000e+00> : vector<128x128xf32>
    %7 = tpu.matmul %5, %6, %cst_3 {dimension_numbers = #tpu.dot_dimension_numbers<[1], [0], [0], [1], [0, 0, 1, 1], [], []>, precision = #tpu.contract_precision<fp32>} : vector<128x256xf32>, vector<256x128xf32>, vector<128x128xf32> -> vector<128x128xf32>
    %8 = tpu.transpose %7, [1, 0] : vector<128x128xf32> -> vector<128x128xf32>
    %9 = vector.extract_strided_slice %8 {offsets = [0, 0], sizes = [1, 128], strides = [1, 1]} : vector<128x128xf32> to vector<1x128xf32>
    %cst_4 = arith.constant 1.000000e+00 : f32
    %10 = vector.broadcast %cst_4 : f32 to vector<1x128xf32>
    %11 = arith.divf %10, %9 : vector<1x128xf32>
    %12 = vector.extract_strided_slice %8 {offsets = [1, 0], sizes = [2, 128], strides = [1, 1]} : vector<128x128xf32> to vector<2x128xf32>
    %13 = vector.broadcast %11 : vector<1x128xf32> to vector<2x128xf32>
    %14 = arith.mulf %12, %13 : vector<2x128xf32>
    %c0_5 = arith.constant 0 : index
    %c0_6 = arith.constant 0 : index
    %15 = vector.load %arg3[%c0_5, %c0_6] : memref<2x128xf32, #tpu.memory_space<vmem>>, vector<2x128xf32>
    tpu.vector_store %arg3[%c0_5, %c0_6], %14 {strides = array<i32>} : memref<2x128xf32, #tpu.memory_space<vmem>>, vector<2x128xf32>,
    return
  }
  func.func @transform_0(%arg0: i32) -> (i32, i32) {
    %c0_i32 = arith.constant 0 : i32
    %c0_i32_0 = arith.constant 0 : i32
    return %arg0, %c0_i32 : i32, i32
  }
  func.func @transform_1(%arg0: i32) -> (i32, i32) {
    %c0_i32 = arith.constant 0 : i32
    %c0_i32_0 = arith.constant 0 : i32
    %c0_i32_1 = arith.constant 0 : i32
    return %c0_i32, %c0_i32_0 : i32, i32
  }
  func.func @transform_2(%arg0: i32) -> (i32, i32) {
    %c0_i32 = arith.constant 0 : i32
    %c0_i32_0 = arith.constant 0 : i32
    return %c0_i32, %arg0 : i32, i32
  }
}

</mosaic_0001>

<bundles_post_ra>
// kernel: tpu_custom_call.1
= control target key start
LH: loop header
LB: loop body
LE: loop exit
PB: predicated region body
PF: predicated region fallthrough
CT: control target
= control target key end

     0   :  { %7 = vsyncpa [#allocation3], 0  ;;  %s4183_s0 = inlined_call_operand.hbm [shape: f32[128,256], index: 0, kind: input, shape index: {}]   ;;  %s4184_s1 = inlined_call_operand.hbm [shape: f32[256,128], index: 1, kind: input, shape index: {}]   ;;  %s4185_s2 = inlined_call_operand.hbm [shape: f32[2,128], index: 2, kind: output, shape index: {}]  }
   0x1   :  { %8 = vsyncpa [#allocation6], 0 }
   0x2   :  { %9 = vsyncpa [#allocation4], 0  ;;  %s2827_s9 = smov [#allocation2]   ;;  %s2755_s13 = scalar_lea.hbm %s4183_s0, 4096 }
   0x3   :  { %s15_s10 = sshll.u32 %s2827_s9, 4  ;;  %p2756_p0 = scmp.ne.s32.totalorder %s4183_s0, %s2755_s13  ;;  %s16_s10 = int_to_ptr.vmem [resolvable:$true] %s15_s10 }
   0x4   :  { %p2759_p1 = scmp.lt.u32.totalorder %s2755_s13, %s4183_s0 }
   0x6   :  { %p2761_p2 = pnand %p2759_p1, %p2756_p0 }
   0x8   :  { %2764 = shalt.err (!%p2761_p2)
}
   0x9   :  { %s2765_s18 = scalar_lea.vmem %s16_s10, 4096  ;;  %p2770_p4 = scmp.lt.s32.totalorder %s16_s10, %s16_s10 }
   0xa   :  { %p2766_p3 = scmp.ne.s32.totalorder %s16_s10, %s2765_s18  ;;  %p2771_p5 = scmp.lt.s32.totalorder %s2765_s18, %s2765_s18 }
   0xc   :  { %p2772_p6 = por %p2771_p5, %p2770_p4 }
   0xe   :  { %p2773_p7 = pnand %p2772_p6, %p2766_p3 }
  0x10   :  { %2776 = shalt.err (!%p2773_p7)
}
  0x11   :  { %s2828_s19 = smov 256   ;;  %s2829_s20 = smov 16  }
  0x12   :  { %21 = dma.hbm_to_vmem [thread:$0]  %s4183_s0, 4096, %s16_s10, [#allocation3], %s2828_s19, %s2828_s19, %s2829_s20  }
  0x13   :  { %s2830_s23 = smov [#allocation5]   ;;  %s2777_s27 = scalar_lea.hbm %s4184_s1, 4096 }
  0x14   :  { %s27_s24 = sshll.u32 %s2830_s23, 4  ;;  %p2778_p8 = scmp.ne.s32.totalorder %s4184_s1, %s2777_s27  ;;  %s28_s24 = int_to_ptr.vmem [resolvable:$true] %s27_s24 }
  0x15   :  { %p2781_p9 = scmp.lt.u32.totalorder %s2777_s27, %s4184_s1 }
  0x17   :  { %p2783_p10 = pnand %p2781_p9, %p2778_p8 }
  0x19   :  { %2786 = shalt.err (!%p2783_p10)
}
  0x1a   :  { %s2787_s4 = scalar_lea.vmem %s28_s24, 4096  ;;  %p2792_p12 = scmp.lt.s32.totalorder %s28_s24, %s28_s24 }
  0x1b   :  { %p2788_p11 = scmp.ne.s32.totalorder %s28_s24, %s2787_s4  ;;  %p2793_p13 = scmp.lt.s32.totalorder %s2787_s4, %s2787_s4 }
  0x1d   :  { %p2794_p0 = por %p2793_p13, %p2792_p12 }
  0x1f   :  { %p2795_p1 = pnand %p2794_p0, %p2788_p11 }
  0x21   :  { %2798 = shalt.err (!%p2795_p1)
}
  0x22   :  { %s2831_s0 = smov 128   ;;  %s2832_s5 = smov 8  }
  0x23   :  { %33 = dma.hbm_to_vmem [thread:$0]  %s4184_s1, 4096, %s28_s24, [#allocation6], %s2831_s0, %s2831_s0, %s2832_s5  }
  0x24   :  { %2821 = dma.done.wait [#allocation3], 4096  }
  0x25   :  { %2822 = vsyncadd [#allocation3], 4294963200 }
  0x26   :  { %2823 = dma.done.wait [#allocation6], 4096  }
  0x27   :  { %2824 = vsyncadd [#allocation6], 4294963200  ;;  %v2873_v0 = vld [vmem:[#allocation2] sm:$0xff]  ;;  %v2875_v1 = vld [vmem:[#allocation2 + $0x8] sm:$0xff]  ;;  %s2833_s1 = smov [#allocation7]  }
  0x28   :  { %v2877_v2 = vld [vmem:[#allocation2 + $0x20] sm:$0xff]  ;;  %v72_v3 = vmax.f32 %v2873_v0, %v2875_v1  ;;  %v2881_v4 = vld [vmem:[#allocation2 + $0x28] sm:$0xff]  ;;  %v2883_v5 = vld [vmem:[#allocation2 + $0x10] sm:$0xff]  ;;  %s1996_s8 = sshll.u32 %s2833_s1, 4  ;;  %s1997_s8 = int_to_ptr.vmem [resolvable:$true] %s1996_s8 }
  0x29   :  { %v2885_v6 = vld [vmem:[#allocation2 + $0x18] sm:$0xff]  ;;  %v78_v7 = vmax.f32 %v2877_v2, %v2881_v4  ;;  %v2889_v8 = vld [vmem:[#allocation2 + $0x30] sm:$0xff]  ;;  %v2893_v10 = vld [vmem:[#allocation2 + $0x40] sm:$0xff]  ;;  %s2799_s9 = scalar_lea.vmem %s1997_s8, 32  ;;  %p2804_p3 = scmp.lt.s32.totalorder %s1997_s8, %s1997_s8 }
  0x2a   :  { %4376 = vst [vmem:[#allocation11_spill] sm:$0xff] %v2885_v6  ;;  %4377 = vst [vmem:[#allocation12_spill] sm:$0xff] %v2889_v8  ;;  %v2891_v9 = vld [vmem:[#allocation2 + $0x38] sm:$0xff]  ;;  %73 = vmax.xlane.f32.xlu0 %v72_v3  ;;  %v75_v11 = vmax.f32 %v2883_v5, %v2885_v6  ;;  %v2897_v12 = vld [vmem:[#allocation2 + $0x48] sm:$0xff]  ;;  %p2800_p2 = scmp.ne.s32.totalorder %s1997_s8, %s2799_s9  ;;  %p2805_p4 = scmp.lt.s32.totalorder %s2799_s9, %s2799_s9 }
  0x2b   :  { %4378 = vst [vmem:[#allocation13_spill] sm:$0xff] %v2891_v9  ;;  %4379 = vst [vmem:[#allocation14_spill] sm:$0xff] %v2893_v10  ;;  %v2899_v13 = vld [vmem:[#allocation2 + $0x50] sm:$0xff]  ;;  %v2901_v14 = vld [vmem:[#allocation2 + $0x58] sm:$0xff]  ;;  %79 = vmax.xlane.f32.xlu1 %v78_v7  ;;  %v81_v15 = vmax.f32 %v2889_v8, %v2891_v9  ;;  %v84_v25 = vmax.f32 %v2893_v10, %v2897_v12 }
  0x2c   :  { %4380 = vst [vmem:[#allocation15_spill] sm:$0xff] %v2897_v12  ;;  %4381 = vst [vmem:[#allocation16_spill] sm:$0xff] %v2899_v13  ;;  %v2905_v16 = vld [vmem:[#allocation2 + $0x60] sm:$0xff]  ;;  %v2907_v17 = vld [vmem:[#allocation2 + $0x68] sm:$0xff]  ;;  %v87_v29 = vmax.f32 %v2899_v13, %v2901_v14  ;;  %p2806_p5 = por %p2805_p4, %p2804_p3 }
  0x2d   :  { %4382 = vst [vmem:[#allocation17_spill] sm:$0xff] %v2901_v14  ;;  %4383 = vst [vmem:[#allocation18_spill] sm:$0xff] %v2905_v16  ;;  %v2909_v18 = vld [vmem:[#allocation2 + $0x70] sm:$0xff]  ;;  %v2911_v19 = vld [vmem:[#allocation2 + $0x78] sm:$0xff]  ;;  %v90_v33 = vmax.f32 %v2905_v16, %v2907_v17 }
  0x2e   :  { %4384 = vst [vmem:[#allocation19_spill] sm:$0xff] %v2907_v17  ;;  %4385 = vst [vmem:[#allocation20_spill] sm:$0xff] %v2909_v18  ;;  %v2913_v20 = vld [vmem:[#allocation2 + $0x80] sm:$0xff]  ;;  %v2915_v21 = vld [vmem:[#allocation2 + $0x88] sm:$0xff]  ;;  %76 = vmax.xlane.f32.xlu0 %v75_v11  ;;  %v93_v34 = vmax.f32 %v2909_v18, %v2911_v19  ;;  %p2807_p6 = pnand %p2806_p5, %p2800_p2 }
  0x2f   :  { %4386 = vst [vmem:[#allocation21_spill] sm:$0xff] %v2911_v19  ;;  %4387 = vst [vmem:[#allocation22_spill] sm:$0xff] %v2913_v20  ;;  %v2917_v22 = vld [vmem:[#allocation2 + $0x90] sm:$0xff]  ;;  %v2919_v23 = vld [vmem:[#allocation2 + $0x98] sm:$0xff]  ;;  %82 = vmax.xlane.f32.xlu1 %v81_v15  ;;  %v96_v38 = vmax.f32 %v2913_v20, %v2915_v21 }
  0x30   :  { %4388 = vst [vmem:[#allocation23_spill] sm:$0xff] %v2915_v21  ;;  %4389 = vst [vmem:[#allocation24_spill] sm:$0xff] %v2917_v22  ;;  %v2921_v24 = vld [vmem:[#allocation2 + $0xa0] sm:$0xff]  ;;  %v2925_v26 = vld [vmem:[#allocation2 + $0xa8] sm:$0xff]  ;;  %v99_v39 = vmax.f32 %v2917_v22, %v2919_v23 }
  0x31   :  { %4390 = vst [vmem:[#allocation25_spill] sm:$0xff] %v2919_v23  ;;  %4391 = vst [vmem:[#allocation26_spill] sm:$0xff] %v2921_v24  ;;  %v2927_v27 = vld [vmem:[#allocation2 + $0xb0] sm:$0xff]  ;;  %v2929_v28 = vld [vmem:[#allocation2 + $0xb8] sm:$0xff] }
  0x32   :  { %4392 = vst [vmem:[#allocation27_spill] sm:$0xff] %v2925_v26  ;;  %4393 = vst [vmem:[#allocation28_spill] sm:$0xff] %v2927_v27  ;;  %v2933_v30 = vld [vmem:[#allocation2 + $0xc0] sm:$0xff]  ;;  %v2935_v31 = vld [vmem:[#allocation2 + $0xc8] sm:$0xff]  ;;  %85 = vmax.xlane.f32.xlu0 %v84_v25 }
  0x33   :  { %4394 = vst [vmem:[#allocation29_spill] sm:$0xff] %v2929_v28  ;;  %4395 = vst [vmem:[#allocation30_spill] sm:$0xff] %v2933_v30  ;;  %v2937_v32 = vld [vmem:[#allocation2 + $0xd0] sm:$0xff]  ;;  %v2943_v35 = vld [vmem:[#allocation2 + $0xd8] sm:$0xff]  ;;  %88 = vmax.xlane.f32.xlu1 %v87_v29 }
  0x34   :  { %4396 = vst [vmem:[#allocation31_spill] sm:$0xff] %v2935_v31  ;;  %4397 = vst [vmem:[#allocation32_spill] sm:$0xff] %v2937_v32  ;;  %v2945_v36 = vld [vmem:[#allocation2 + $0xe0] sm:$0xff]  ;;  %v2947_v37 = vld [vmem:[#allocation2 + $0xe8] sm:$0xff] }
  0x35   :  { %4398 = vst [vmem:[#allocation33_spill] sm:$0xff] %v2943_v35  ;;  %v2957_v42 = vld [vmem:[#allocation2 + $0xf0] sm:$0xff]  ;;  %v2959_v43 = vld [vmem:[#allocation2 + $0xf8] sm:$0xff]  ;;  %v232_v44 = vld [vmem:[#allocation5 + $0x80] sm:$0xff] }
  0x36   :  { %v233_v48 = vld [vmem:[#allocation5 + $0x88] sm:$0xff]  ;;  %v297_v49 = vand.u32 4294901760, %v232_v44  ;;  %v216_v50 = vld [vmem:[#allocation5] sm:$0xff]  ;;  %v2969_v56 = vld [vmem:[#allocation5 + $0x90] sm:$0xff]  ;;  %91 = vmax.xlane.f32.xlu0 %v90_v33 }
  0x37   :  { %v217_v51 = vld [vmem:[#allocation5 + $0x8] sm:$0xff]  ;;  %v300_v53 = vand.u32 4294901760, %v233_v48  ;;  %v249_v54 = vand.u32 4294901760, %v216_v50  ;;  %v2971_v57 = vld [vmem:[#allocation5 + $0x98] sm:$0xff]  ;;  %v2973_v58 = vld [vmem:[#allocation5 + $0x10] sm:$0xff]  ;;  %v303_v60 = vand.u32 4294901760, %v2969_v56  ;;  %94 = vmax.xlane.f32.xlu1 %v93_v34 }
  0x38   :  { %v252_v55 = vand.u32 4294901760, %v217_v51  ;;  %v2975_v59 = vsub.f32 %v232_v44, %v297_v49  ;;  %v306_v61 = vand.u32 4294901760, %v2971_v57  ;;  %v219_v62 = vld [vmem:[#allocation5 + $0x18] sm:$0xff]  ;;  %v255_v63 = vand.u32 4294901760, %v2973_v58  ;;  %v3031_v22 = vld [vmem:[#allocation5 + $0xa8] sm:$0xff]  ;;  %v3041_v18 = vld [vmem:[#allocation5 + $0xb0] sm:$0xff] }
  0x39   :  { %v2980_v3 = vsub.f32 %v233_v48, %v300_v53  ;;  %v2982_v7 = vsub.f32 %v216_v50, %v249_v54  ;;  %v258_v15 = vand.u32 4294901760, %v219_v62  ;;  %v2988_v29 = vsub.f32 %v2969_v56, %v303_v60  ;;  %v246_v13 = vld [vmem:[#allocation5 + $0xf0] sm:$0xff] }
  0x3a   :  { %v2984_v11 = vsub.f32 %v217_v51, %v252_v55  ;;  %v4186_v25 = vand.u32 4294901760, %v2975_v59  ;;  %v2991_v44 = vsub.f32 %v2971_v57, %v306_v61  ;;  %v2994_v52 = vsub.f32 %v2973_v58, %v255_v63  ;;  %97 = vmax.xlane.f32.xlu0 %v96_v38 }
  0x3b   :  { %v4187_v48 = vand.u32 4294901760, %v2980_v3  ;;  %v4188_v50 = vand.u32 4294901760, %v2982_v7  ;;  %v2999_v47 = vsub.f32 %v219_v62, %v258_v15  ;;  %v4192_v56 = vand.u32 4294901760, %v2988_v29  ;;  %100 = vmax.xlane.f32.xlu1 %v99_v39 }
  0x3c   :  { %4399 = vst [vmem:[#allocation34_spill] sm:$0xff] %v2991_v44  ;;  %v4190_v51 = vand.u32 4294901760, %v2984_v11  ;;  %v701_v33 = vsub.f32 %v2975_v59, %v4186_v25  ;;  %v4194_v57 = vand.u32 4294901760, %v2991_v44  ;;  %v4197_v58 = vand.u32 4294901760, %v2994_v52 }
  0x3d   :  { %v708_v34 = vsub.f32 %v2980_v3, %v4187_v48  ;;  %v589_v46 = vsub.f32 %v2982_v7, %v4188_v50  ;;  %v4199_v25 = vand.u32 4294901760, %v2999_v47  ;;  %v715_v41 = vsub.f32 %v2988_v29, %v4192_v56  ;;  %v3033_v56 = vld [vmem:[#allocation5 + $0x20] sm:$0xff] }
  0x3e   :  { %v596_v62 = vsub.f32 %v2984_v11, %v4190_v51  ;;  %v702_v45 = vand.u32 4294901760, %v701_v33  ;;  %v722_v48 = vsub.f32 %v2991_v44, %v4194_v57  ;;  %v603_v50 = vsub.f32 %v2994_v52, %v4197_v58  ;;  %v3029_v33 = vld [vmem:[#allocation5 + $0xa0] sm:$0xff]  ;;  %v3037_v58 = vld [vmem:[#allocation5 + $0x28] sm:$0xff] }
  0x3f   :  { %v709_v40 = vand.u32 4294901760, %v708_v34  ;;  %v590_v23 = vand.u32 4294901760, %v589_v46  ;;  %v610_v38 = vsub.f32 %v2999_v47, %v4199_v25  ;;  %v716_v21 = vand.u32 4294901760, %v715_v41 }
  0x40   :  { %v597_v51 = vand.u32 4294901760, %v596_v62  ;;  %v723_v57 = vand.u32 4294901760, %v722_v48  ;;  %v604_v20 = vand.u32 4294901760, %v603_v50  ;;  %v3035_v19 = vpack.c.bf16 %v300_v53, %v297_v49 }
  0x41   :  { %v2518_v39 = vpack.c.bf16 %v709_v40, %v702_v45  ;;  %v611_v34 = vand.u32 4294901760, %v610_v38  ;;  %v3039_v62 = vpack.c.bf16 %v252_v55, %v249_v54  ;;  %v4401_v25 = vmax.f32 %v2921_v24, %v2925_v26  ;;  %v3050_v40 = vld [vmem:[#allocation5 + $0xb8] sm:$0xff] }
  0x42   :  { %v2520_v46 = vpack.c.bf16 %v597_v51, %v590_v23  ;;  %v2522_v17 = vpack.c.bf16 %v723_v57, %v716_v21  ;;  %2487 = vmatprep.subr.bf16.mxu0 %v3035_v19  ;;  %v309_v41 = vand.u32 4294901760, %v3029_v33  ;;  %v312_v49 = vand.u32 4294901760, %v3031_v22  ;;  %v3052_v23 = vld [vmem:[#allocation5 + $0x30] sm:$0xff]  ;;  %v3054_v45 = vld [vmem:[#allocation5 + $0x38] sm:$0xff] }
  0x43   :  { %4400 = vst [vmem:[#allocation35_spill] sm:$0xff] %v3039_v62  ;;  %103 = vmax.xlane.f32.xlu0 %v4401_v25  ;;  %v261_v53 = vand.u32 4294901760, %v3033_v56  ;;  %v4402_v54 = vmax.f32 %v2927_v27, %v2929_v28  ;;  %2519 = vmatprep.subr.bf16.mxu1 %v2518_v39  ;;  %v2524_v21 = vpack.c.bf16 %v611_v34, %v604_v20  ;;  %v264_v55 = vand.u32 4294901760, %v3037_v58 }
  0x44   :  { %v3060_v25 = vpack.c.bf16 %v306_v61, %v303_v60  ;;  %v3062_v48 = vpack.c.bf16 %v258_v15, %v255_v63  ;;  %2521 = vmatpush3.bf16.msra.mxu1 %v2520_v46  ;;  %2489 = vmatpush3.bf16.msra.mxu0 %v3039_v62  ;;  %v3066_v50 = vsub.f32 %v3029_v33, %v309_v41  ;;  %v315_v20 = vand.u32 4294901760, %v3041_v18  ;;  %v3234_v62 = vld [vmem:[#allocation5 + $0xe8] sm:$0xff] }
  0x45   :  { %106 = vmax.xlane.f32.xlu1 %v4402_v54  ;;  %v3069_v51 = vsub.f32 %v3031_v22, %v312_v49  ;;  %v3072_v57 = vsub.f32 %v3033_v56, %v261_v53  ;;  %2523 = vmatprep.subr.bf16.mxu1 %v2522_v17  ;;  %v3076_v60 = vsub.f32 %v3037_v58, %v264_v55  ;;  %v318_v61 = vand.u32 4294901760, %v3050_v40 }
  0x46   :  { %4403 = vst [vmem:[#allocation36_spill] sm:$0xff] %v3060_v25  ;;  %4404 = vst [vmem:[#allocation37_spill] sm:$0xff] %v3062_v48  ;;  %2491 = vmatprep.subr.bf16.mxu0 %v3060_v25  ;;  %v4203_v63 = vand.u32 4294901760, %v3052_v23  ;;  %v4201_v15 = vand.u32 4294901760, %v3054_v45  ;;  %v4406_v22 = vmax.f32 %v2933_v30, %v2935_v31  ;;  %v4202_v56 = vand.u32 4294901760, %v3066_v50  ;;  %v3131_v30 = vld [vmem:[#allocation5 + $0xc0] sm:$0xff] }
  0x47   :  { %4405 = vst [vmem:[#allocation38_spill] sm:$0xff] %v3069_v51  ;;  %v4204_v38 = vand.u32 4294901760, %v3069_v51  ;;  %v4206_v17 = vand.u32 4294901760, %v3072_v57  ;;  %v3089_v58 = vsub.f32 %v3041_v18, %v315_v20  ;;  %v4407_v33 = vmax.f32 %v2937_v32, %v2943_v35 }
  0x48   :  { %109 = vmax.xlane.f32.xlu0 %v4406_v22  ;;  %v4210_v39 = vand.u32 4294901760, %v3076_v60  ;;  %v3096_v46 = vsub.f32 %v3050_v40, %v318_v61  ;;  %v3101_v34 = vsub.f32 %v3052_v23, %v4203_v63  ;;  %v3106_v54 = vsub.f32 %v3054_v45, %v4201_v15  ;;  %2525 = vmatpush3.bf16.msra.mxu1 %v2524_v21 }
  0x49   :  { %112 = vmax.xlane.f32.xlu1 %v4407_v33  ;;  %v729_v18 = vsub.f32 %v3066_v50, %v4202_v56  ;;  %v736_v40 = vsub.f32 %v3069_v51, %v4204_v38  ;;  %v617_v22 = vsub.f32 %v3072_v57, %v4206_v17  ;;  %2493 = vmatpush3.bf16.msra.mxu0 %v3062_v48  ;;  %v4211_v33 = vand.u32 4294901760, %v3089_v58  ;;  %v3225_v48 = vld [vmem:[#allocation5 + $0xe0] sm:$0xff] }
  0x4a   :  { %4408 = vst [vmem:[#allocation39_spill] sm:$0xff] %v3096_v46  ;;  %v624_v21 = vsub.f32 %v3076_v60, %v4210_v39  ;;  %v4212_v15 = vand.u32 4294901760, %v3096_v46  ;;  %v4409_v38 = vmax.f32 %v2945_v36, %v2947_v37  ;;  %v4410_v39 = vmax.f32 %v2957_v42, %v2959_v43 }
  0x4b   :  { %v730_v35 = vand.u32 4294901760, %v729_v18  ;;  %v737_v17 = vand.u32 4294901760, %v736_v40  ;;  %v618_v32 = vand.u32 4294901760, %v617_v22  ;;  %v743_v31 = vsub.f32 %v3089_v58, %v4211_v33  ;;  %v3145_v40 = vld [vmem:[#allocation5 + $0xc8] sm:$0xff]  ;;  %v3147_v22 = vld [vmem:[#allocation5 + $0x40] sm:$0xff] }
  0x4c   :  { %115 = vmax.xlane.f32.xlu0 %v4409_v38  ;;  %v625_v56 = vand.u32 4294901760, %v624_v21  ;;  %v750_v63 = vsub.f32 %v3096_v46, %v4212_v15  ;;  %v4411_v36 = vand.u32 4294901760, %v3101_v34  ;;  %v4412_v38 = vand.u32 4294901760, %v3106_v54  ;;  %v3149_v33 = vld [vmem:[#allocation5 + $0x48] sm:$0xff]  ;;  %v3155_v15 = vld [vmem:[#allocation5 + $0xd0] sm:$0xff] }
  0x4d   :  { %118 = vmax.xlane.f32.xlu1 %v4410_v39  ;;  %v2526_v42 = vpack.c.bf16 %v737_v17, %v730_v35  ;;  %v744_v43 = vand.u32 4294901760, %v743_v31  ;;  %v3151_v39 = vpack.c.bf16 %v312_v49, %v309_v41  ;;  %v3153_v21 = vpack.c.bf16 %v264_v55, %v261_v53  ;;  %v3162_v41 = vld [vmem:[#allocation5 + $0xd8] sm:$0xff]  ;;  %v3164_v49 = vld [vmem:[#allocation5 + $0x50] sm:$0xff] }
  0x4e   :  { %v631_v37 = vsub.f32 %v3101_v34, %v4411_v36  ;;  %v638_v18 = vsub.f32 %v3106_v54, %v4412_v38  ;;  %v2528_v28 = vpack.c.bf16 %v625_v56, %v618_v32  ;;  %v751_v36 = vand.u32 4294901760, %v750_v63 }
  0x4f   :  { %4413 = vst [vmem:[#allocation40_spill] sm:$0xff] %v3151_v39  ;;  %4414 = vst [vmem:[#allocation41_spill] sm:$0xff] %v3153_v21  ;;  %2527 = vmatprep.subr.bf16.mxu1 %v2526_v42  ;;  %2495 = vmatprep.subr.bf16.mxu0 %v3151_v39  ;;  %v321_v38 = vand.u32 4294901760, %v3131_v30  ;;  %v324_v24 = vand.u32 4294901760, %v3145_v40  ;;  %v273_v35 = vand.u32 4294901760, %v3147_v22  ;;  %v276_v31 = vand.u32 4294901760, %v3149_v33 }
  0x50   :  { %v632_v27 = vand.u32 4294901760, %v631_v37  ;;  %v639_v26 = vand.u32 4294901760, %v638_v18  ;;  %2529 = vmatpush3.bf16.msra.mxu1 %v2528_v28  ;;  %v2530_v32 = vpack.c.bf16 %v751_v36, %v744_v43  ;;  %2497 = vmatpush3.bf16.msra.mxu0 %v3153_v21  ;;  %v3167_v55 = vpack.c.bf16 %v318_v61, %v315_v20  ;;  %v227_v28 = vld [vmem:[#allocation5 + $0x58] sm:$0xff] }
  0x51   :  { %v327_v63 = vand.u32 4294901760, %v3155_v15  ;;  %v3171_v56 = vsub.f32 %v3131_v30, %v321_v38  ;;  %v3174_v17 = vsub.f32 %v3145_v40, %v324_v24  ;;  %v3177_v37 = vsub.f32 %v3147_v22, %v273_v35 }
  0x52   :  { %v2532_v53 = vpack.c.bf16 %v639_v26, %v632_v27  ;;  %4415 = vst [vmem:[#allocation42_spill] sm:$0xff] %v3167_v55  ;;  %v3180_v18 = vsub.f32 %v3149_v33, %v276_v31  ;;  %2531 = vmatprep.subr.bf16.mxu1 %v2530_v32  ;;  %2499 = vmatprep.subr.bf16.mxu0 %v3167_v55  ;;  %v4416_v26 = vand.u32 4294901760, %v3052_v23  ;;  %v4417_v27 = vand.u32 4294901760, %v3054_v45 }
  0x53   :  { %v330_v30 = vand.u32 4294901760, %v3162_v41  ;;  %v3191_v61 = vsub.f32 %v3155_v15, %v327_v63  ;;  %v279_v40 = vand.u32 4294901760, %v3164_v49  ;;  %v4217_v33 = vand.u32 4294901760, %v3171_v56 }
  0x54   :  { %v3187_v20 = vpack.c.bf16 %v4417_v27, %v4416_v26  ;;  %v4222_v22 = vand.u32 4294901760, %v3174_v17  ;;  %v4229_v42 = vand.u32 4294901760, %v3177_v37  ;;  %v4230_v43 = vand.u32 4294901760, %v3180_v18  ;;  %2533 = vmatpush3.bf16.msra.mxu1 %v2532_v53 }
  0x55   :  { %v4231_v23 = vand.u32 4294901760, %v3191_v61  ;;  %v3201_v45 = vsub.f32 %v3162_v41, %v330_v30  ;;  %v282_v15 = vand.u32 4294901760, %v227_v28  ;;  %v3204_v36 = vsub.f32 %v3164_v49, %v279_v40 }
  0x56   :  { %4418 = vst [vmem:[#allocation43_spill] sm:$0xff] %v3187_v20  ;;  %2501 = vmatpush3.bf16.msra.mxu0 %v3187_v20  ;;  %v757_v32 = vsub.f32 %v3171_v56, %v4217_v33  ;;  %v764_v26 = vsub.f32 %v3174_v17, %v4222_v22  ;;  %v645_v53 = vsub.f32 %v3177_v37, %v4229_v42  ;;  %v333_v14 = vand.u32 4294901760, %v3225_v48 }
  0x57   :  { %v652_v41 = vsub.f32 %v3180_v18, %v4230_v43  ;;  %v771_v49 = vsub.f32 %v3191_v61, %v4231_v23  ;;  %v4237_v27 = vand.u32 4294901760, %v3201_v45  ;;  %v4238_v33 = vand.u32 4294901760, %v3204_v36 }
  0x58   :  { %v3223_v20 = vsub.f32 %v227_v28, %v282_v15  ;;  %v758_v55 = vand.u32 4294901760, %v757_v32  ;;  %v765_v22 = vand.u32 4294901760, %v764_v26  ;;  %v646_v21 = vand.u32 4294901760, %v645_v53  ;;  %v3236_v28 = vld [vmem:[#allocation5 + $0x60] sm:$0xff]  ;;  %v3238_v32 = vld [vmem:[#allocation5 + $0x68] sm:$0xff] }
  0x59   :  { %v653_v39 = vand.u32 4294901760, %v652_v41  ;;  %v772_v42 = vand.u32 4294901760, %v771_v49  ;;  %v778_v43 = vsub.f32 %v3201_v45, %v4237_v27  ;;  %v659_v23 = vsub.f32 %v3204_v36, %v4238_v33 }
  0x5a   :  { %v4242_v25 = vand.u32 4294901760, %v3223_v20  ;;  %v2534_v26 = vpack.c.bf16 %v765_v22, %v758_v55  ;;  %v3240_v41 = vpack.c.bf16 %v324_v24, %v321_v38  ;;  %v3242_v49 = vpack.c.bf16 %v276_v31, %v273_v35  ;;  %v247_v38 = vld [vmem:[#allocation5 + $0xf8] sm:$0xff]  ;;  %v230_v35 = vld [vmem:[#allocation5 + $0x70] sm:$0xff] }
  0x5b   :  { %v2536_v53 = vpack.c.bf16 %v653_v39, %v646_v21  ;;  %v779_v16 = vand.u32 4294901760, %v778_v43  ;;  %v660_v27 = vand.u32 4294901760, %v659_v23  ;;  %v336_v12 = vand.u32 4294901760, %v3234_v62 }
  0x5c   :  { %4419 = vst [vmem:[#allocation44_spill] sm:$0xff] %v3240_v41  ;;  %4420 = vst [vmem:[#allocation45_spill] sm:$0xff] %v3242_v49  ;;  %v666_v33 = vsub.f32 %v3223_v20, %v4242_v25  ;;  %2535 = vmatprep.subr.bf16.mxu1 %v2534_v26  ;;  %2503 = vmatprep.subr.bf16.mxu0 %v3240_v41  ;;  %v285_v39 = vand.u32 4294901760, %v3236_v28  ;;  %v288_v24 = vand.u32 4294901760, %v3238_v32 }
  0x5d   :  { %v3252_v21 = vpack.c.bf16 %v330_v30, %v327_v63  ;;  %2537 = vmatpush3.bf16.msra.mxu1 %v2536_v53  ;;  %v2538_v31 = vpack.c.bf16 %v779_v16, %v772_v42  ;;  %2505 = vmatpush3.bf16.msra.mxu0 %v3242_v49  ;;  %v3256_v22 = vsub.f32 %v3225_v48, %v333_v14  ;;  %v339_v16 = vand.u32 4294901760, %v246_v13  ;;  %v231_v30 = vld [vmem:[#allocation5 + $0x78] sm:$0xff] }
  0x5e   :  { %v667_v55 = vand.u32 4294901760, %v666_v33  ;;  %v3258_v43 = vpack.c.bf16 %v282_v15, %v279_v40  ;;  %v3261_v23 = vsub.f32 %v3234_v62, %v336_v12  ;;  %v3264_v26 = vsub.f32 %v3236_v28, %v285_v39 }
  0x5f   :  { %4421 = vst [vmem:[#allocation46_spill] sm:$0xff] %v3252_v21  ;;  %v3267_v63 = vsub.f32 %v3238_v32, %v288_v24  ;;  %2507 = vmatprep.subr.bf16.mxu0 %v3252_v21  ;;  %2539 = vmatprep.subr.bf16.mxu1 %v2538_v31  ;;  %v4243_v48 = vand.u32 4294901760, %v3256_v22  ;;  %v342_v42 = vand.u32 4294901760, %v247_v38  ;;  %v291_v40 = vand.u32 4294901760, %v230_v35 }
  0x60   :  { %4422 = vst [vmem:[#allocation47_spill] sm:$0xff] %v3258_v43  ;;  %v2540_v33 = vpack.c.bf16 %v667_v55, %v660_v27  ;;  %v4252_v15 = vand.u32 4294901760, %v3261_v23  ;;  %v4253_v62 = vand.u32 4294901760, %v3264_v26  ;;  %v3274_v53 = vsub.f32 %v246_v13, %v339_v16 }
  0x61   :  { %v4254_v28 = vand.u32 4294901760, %v3267_v63  ;;  %v785_v32 = vsub.f32 %v3256_v22, %v4243_v48  ;;  %2509 = vmatpush3.bf16.msra.mxu0 %v3258_v43  ;;  %v3280_v27 = vsub.f32 %v247_v38, %v342_v42  ;;  %v294_v31 = vand.u32 4294901760, %v231_v30 }
  0x62   :  { %2541 = vmatpush3.bf16.msra.mxu1 %v2540_v33  ;;  %v3282_v55 = vsub.f32 %v230_v35, %v291_v40  ;;  %v792_v25 = vsub.f32 %v3261_v23, %v4252_v15  ;;  %v673_v13 = vsub.f32 %v3264_v26, %v4253_v62  ;;  %v4259_v48 = vand.u32 4294901760, %v3274_v53 }
  0x63   :  { %v680_v33 = vsub.f32 %v3267_v63, %v4254_v28  ;;  %v786_v43 = vand.u32 4294901760, %v785_v32  ;;  %v4260_v38 = vand.u32 4294901760, %v3280_v27  ;;  %v3296_v21 = vsub.f32 %v231_v30, %v294_v31 }
  0x64   :  { %4423 = vst [vmem:[#allocation48_spill] sm:$0xff] %v3282_v55  ;;  %v4262_v35 = vand.u32 4294901760, %v3282_v55  ;;  %v793_v49 = vand.u32 4294901760, %v792_v25  ;;  %v674_v41 = vand.u32 4294901760, %v673_v13  ;;  %v799_v62 = vsub.f32 %v3274_v53, %v4259_v48 }
  0x65   :  { %4424 = vst [vmem:[#allocation49_spill] sm:$0xff] %v3296_v21  ;;  %v681_v15 = vand.u32 4294901760, %v680_v33  ;;  %v806_v28 = vsub.f32 %v3280_v27, %v4260_v38  ;;  %v4261_v10 = vand.u32 4294901760, %v3296_v21  ;;  %v3308_v9 = vpack.c.bf16 %v336_v12, %v333_v14 }
  0x66   :  { %v687_v32 = vsub.f32 %v3282_v55, %v4262_v35  ;;  %v2542_v30 = vpack.c.bf16 %v793_v49, %v786_v43  ;;  %v800_v13 = vand.u32 4294901760, %v799_v62  ;;  %v3310_v33 = vpack.c.bf16 %v288_v24, %v285_v39  ;;  %v4427_v62 = vld [vmem:[#allocation11_spill] sm:$0xff]  ;;  %v4455_v24 = vld [vmem:[#allocation36_spill] sm:$0xff] }
  0x67   :  { %4425 = vst [vmem:[#allocation50_spill] sm:$0xff] %v3308_v9  ;;  %v2544_v25 = vpack.c.bf16 %v681_v15, %v674_v41  ;;  %v807_v8 = vand.u32 4294901760, %v806_v28  ;;  %v694_v48 = vsub.f32 %v3296_v21, %v4261_v10  ;;  %2511 = vmatprep.subr.bf16.mxu0 %v3308_v9  ;;  %v3316_v38 = vpack.c.bf16 %v342_v42, %v339_v16 }
  0x68   :  { %v688_v6 = vand.u32 4294901760, %v687_v32  ;;  %2543 = vmatprep.subr.bf16.mxu1 %v2542_v30  ;;  %2513 = vmatpush3.bf16.msra.mxu0 %v3310_v33  ;;  %v3319_v12 = vpack.c.bf16 %v294_v31, %v291_v40  ;;  %v2550_v14 = vpack.c.bf16 %v2980_v3, %v2975_v59 }
  0x69   :  { %4426 = vst [vmem:[#allocation51_spill] sm:$0xff] %v3316_v38  ;;  %2545 = vmatpush3.bf16.msra.mxu1 %v2544_v25  ;;  %v2546_v49 = vpack.c.bf16 %v807_v8, %v800_v13  ;;  %v695_v39 = vand.u32 4294901760, %v694_v48  ;;  %2515 = vmatprep.subr.bf16.mxu0 %v3316_v38 }
  0x6b   :  { %2547 = vmatprep.subr.bf16.mxu1 %v2546_v49  ;;  %v2548_v40 = vpack.c.bf16 %v695_v39, %v688_v6 }
  0x6c   :  { %2517 = vmatpush3.bf16.msra.mxu0 %v3319_v12 }
  0x6d   :  { %2549 = vmatpush3.bf16.msra.mxu1 %v2548_v40  ;;  %2551 = vmatprep.subr.bf16.mxu0 %v2550_v14 }
  0x6e   :  { %2583 = vmatprep.subr.bf16.mxu1 %v3035_v19 }
  0xb7   :  { %v74_v13 = vpop.xlane.xlu0 %73 }
  0xb8   :  { %v120_v14 = vsub.f32 %v2873_v0, %v74_v13  ;;  %v121_v49 = vsub.f32 %v2875_v1, %v74_v13  ;;  %v80_v39 = vpop.xlane.xlu1 %79  ;;  %v4428_v0 = vld [vmem:[#allocation12_spill] sm:$0xff]  ;;  %v4429_v1 = vld [vmem:[#allocation13_spill] sm:$0xff] }
  0xb9   :  { %v124_v40 = vsub.f32 %v2877_v2, %v80_v39  ;;  %v125_v10 = vsub.f32 %v2881_v4, %v80_v39  ;;  %v4431_v39 = vld [vmem:[#allocation15_spill] sm:$0xff] }
  0xba   :  { %v152_v35 = vmul.f32 1.442695, %v120_v14  ;;  %v154_v31 = vmul.f32 1.442695, %v121_v49 }
  0xbb   :  { %v160_v28 = vmul.f32 1.442695, %v124_v40  ;;  %v162_v32 = vmul.f32 1.442695, %v125_v10  ;;  %v77_v6 = vpop.xlane.xlu0 %76  ;;  %v4430_v10 = vld [vmem:[#allocation14_spill] sm:$0xff] }
  0xbc   :  { %2685 = vpow2.f32 %v152_v35  ;;  %v122_v30 = vsub.f32 %v2883_v5, %v77_v6  ;;  %v123_v25 = vsub.f32 %v4427_v62, %v77_v6  ;;  %v83_v15 = vpop.xlane.xlu1 %82  ;;  %v4432_v62 = vld [vmem:[#allocation16_spill] sm:$0xff] }
  0xbd   :  { %2687 = vpow2.f32 %v154_v31  ;;  %v126_v48 = vsub.f32 %v4428_v0, %v83_v15  ;;  %v127_v13 = vsub.f32 %v4429_v1, %v83_v15  ;;  %v4433_v31 = vld [vmem:[#allocation17_spill] sm:$0xff] }
  0xbe   :  { %2689 = vpow2.f32 %v160_v28  ;;  %v156_v2 = vmul.f32 1.442695, %v122_v30  ;;  %v158_v8 = vmul.f32 1.442695, %v123_v25  ;;  %v4434_v25 = vld [vmem:[#allocation18_spill] sm:$0xff] }
  0xbf   :  { %2691 = vpow2.f32 %v162_v32  ;;  %v164_v4 = vmul.f32 1.442695, %v126_v48  ;;  %v166_v14 = vmul.f32 1.442695, %v127_v13  ;;  %v86_v49 = vpop.xlane.xlu0 %85  ;;  %v4435_v13 = vld [vmem:[#allocation19_spill] sm:$0xff] }
  0xc0   :  { %2693 = vpow2.f32 %v156_v2  ;;  %v128_v35 = vsub.f32 %v4430_v10, %v86_v49  ;;  %v129_v5 = vsub.f32 %v4431_v39, %v86_v49  ;;  %v89_v40 = vpop.xlane.xlu1 %88  ;;  %v4436_v49 = vld [vmem:[#allocation20_spill] sm:$0xff]  ;;  %v4437_v39 = vld [vmem:[#allocation21_spill] sm:$0xff] }
  0xc1   :  { %2695 = vpow2.f32 %v158_v8  ;;  %v130_v6 = vsub.f32 %v4432_v62, %v89_v40  ;;  %v131_v0 = vsub.f32 %v4433_v31, %v89_v40 }
  0xc2   :  { %2697 = vpow2.f32 %v164_v4  ;;  %v168_v15 = vmul.f32 1.442695, %v128_v35  ;;  %v170_v28 = vmul.f32 1.442695, %v129_v5 }
  0xc3   :  { %2699 = vpow2.f32 %v166_v14  ;;  %v172_v30 = vmul.f32 1.442695, %v130_v6  ;;  %v174_v32 = vmul.f32 1.442695, %v131_v0  ;;  %v92_v48 = vpop.xlane.xlu0 %91 }
  0xc4   :  { %2701 = vpow2.f32 %v168_v15  ;;  %v132_v1 = vsub.f32 %v4434_v25, %v92_v48  ;;  %v133_v2 = vsub.f32 %v4435_v13, %v92_v48  ;;  %v95_v10 = vpop.xlane.xlu1 %94  ;;  %v4441_v25 = vld [vmem:[#allocation23_spill] sm:$0xff] }
  0xc5   :  { %2703 = vpow2.f32 %v170_v28  ;;  %v134_v8 = vsub.f32 %v4436_v49, %v95_v10  ;;  %v135_v62 = vsub.f32 %v4437_v39, %v95_v10  ;;  %v4440_v28 = vld [vmem:[#allocation22_spill] sm:$0xff] }
  0xc6   :  { %v2686_v42 = vpop.eup %2685  ;;  %2705 = vpow2.f32 %v172_v30  ;;  %v176_v4 = vmul.f32 1.442695, %v132_v1  ;;  %v178_v35 = vmul.f32 1.442695, %v133_v2  ;;  %v4444_v1 = vand.u32 4294901760, %v2980_v3 }
  0xc7   :  { %v2688_v5 = vpop.eup %2687  ;;  %2707 = vpow2.f32 %v174_v32  ;;  %v3372_v14 = vand.u32 4294901760, %v2686_v42  ;;  %v180_v40 = vmul.f32 1.442695, %v134_v8  ;;  %v182_v6 = vmul.f32 1.442695, %v135_v62  ;;  %v98_v31 = vpop.xlane.xlu0 %97 }
  0xc8   :  { %v2690_v0 = vpop.eup %2689  ;;  %v3374_v15 = vand.u32 4294901760, %v2688_v5  ;;  %2709 = vpow2.f32 %v176_v4  ;;  %v136_v48 = vsub.f32 %v4440_v28, %v98_v31  ;;  %v137_v13 = vsub.f32 %v4441_v25, %v98_v31  ;;  %v101_v10 = vpop.xlane.xlu1 %100  ;;  %v4447_v4 = vld [vmem:[#allocation24_spill] sm:$0xff] }
  0xc9   :  { %4438 = vst [vmem:[#allocation11_spill] sm:$0xff] %v3372_v14  ;;  %v2692_v49 = vpop.eup %2691  ;;  %2711 = vpow2.f32 %v178_v35  ;;  %v3379_v30 = vsub.f32 %v2686_v42, %v3372_v14  ;;  %v4443_v32 = vand.u32 4294901760, %v2975_v59  ;;  %v138_v31 = vsub.f32 %v4447_v4, %v101_v10 }
  0xca   :  { %4439 = vst [vmem:[#allocation12_spill] sm:$0xff] %v3374_v15  ;;  %v2694_v8 = vpop.eup %2693  ;;  %810 = vmatprep.mubr.f32.mxu1 %v3374_v15  ;;  %2713 = vpow2.f32 %v180_v40  ;;  %v3389_v39 = vsub.f32 %v2688_v5, %v3374_v15  ;;  %v184_v62 = vmul.f32 1.442695, %v136_v48  ;;  %v3395_v59 = vand.u32 4294901760, %v2692_v49  ;;  %v4451_v40 = vld [vmem:[#allocation35_spill] sm:$0xff]  ;;  %v4452_v48 = vld [vmem:[#allocation25_spill] sm:$0xff] }
  0xcb   :  { %4442 = vst [vmem:[#allocation13_spill] sm:$0xff] %v3379_v30  ;;  %v3385_v2 = vpack.c.bf16 %v4444_v1, %v4443_v32  ;;  %v2696_v35 = vpop.eup %2695  ;;  %812 = vmatmul.mubr.f32.vlgmr.msra.gmra.mrb[0].mxu1 %v3372_v14  ;;  %v3393_v42 = vand.u32 4294901760, %v2694_v8  ;;  %v4263_v3 = vand.u32 4294901760, %v3379_v30  ;;  %v186_v28 = vmul.f32 1.442695, %v137_v13 }
  0xcc   :  { %4446 = vst [vmem:[#allocation15_spill] sm:$0xff] %v3389_v39  ;;  %4449 = vst [vmem:[#allocation17_spill] sm:$0xff] %v3395_v59  ;;  %v3398_v25 = vpop.eup %2697  ;;  %v3400_v32 = vand.u32 4294901760, %v2696_v35  ;;  %2715 = vpow2.f32 %v182_v6  ;;  %v4268_v5 = vand.u32 4294901760, %v3389_v39  ;;  %2585 = vmatpush3.bf16.msra.mxu1 %v4451_v40  ;;  %v139_v1 = vsub.f32 %v4452_v48, %v101_v10 }
  0xcd   :  { %4445 = vst [vmem:[#allocation14_spill] sm:$0xff] %v3385_v2  ;;  %4448 = vst [vmem:[#allocation16_spill] sm:$0xff] %v3393_v42  ;;  %v2700_v4 = vpop.eup %2699  ;;  %v353_v16 = vsub.f32 %v3379_v30, %v4263_v3  ;;  %v3408_v43 = vand.u32 4294901760, %v2690_v0  ;;  %2717 = vpow2.f32 %v184_v62  ;;  %v3411_v13 = vsub.f32 %v2694_v8, %v3393_v42  ;;  %2587 = vmatprep.subr.bf16.mxu1 %v4455_v24 }
  0xce   :  { %4450 = vst [vmem:[#allocation18_spill] sm:$0xff] %v3400_v32  ;;  %v3414_v6 = vpop.eup %2701  ;;  %817 = vmatprep.mubr.f32.mxu1 %v3400_v32  ;;  %v347_v10 = vsub.f32 %v3389_v39, %v4268_v5  ;;  %v3421_v48 = vsub.f32 %v2696_v35, %v3400_v32  ;;  %v3423_v3 = vand.u32 4294901760, %v2700_v4  ;;  %v188_v41 = vmul.f32 1.442695, %v138_v31 }
  0xcf   :  { %4453 = vst [vmem:[#allocation19_spill] sm:$0xff] %v3408_v43  ;;  %4454 = vst [vmem:[#allocation20_spill] sm:$0xff] %v3411_v13  ;;  %v3425_v62 = vpop.eup %2703  ;;  %819 = vmatmul.mubr.f32.gmra.mrb[2].mxu1 %v3393_v42  ;;  %v354_v8 = vand.u32 4294901760, %v353_v16  ;;  %2719 = vpow2.f32 %v186_v28  ;;  %v4277_v14 = vand.u32 4294901760, %v3411_v13  ;;  %v3430_v15 = vsub.f32 %v2692_v49, %v3395_v59  ;;  %v4459_v42 = vld [vmem:[#allocation37_spill] sm:$0xff] }
  0xd0   :  { %4456 = vst [vmem:[#allocation21_spill] sm:$0xff] %v3421_v48  ;;  %4457 = vst [vmem:[#allocation22_spill] sm:$0xff] %v3423_v3  ;;  %v104_v24 = vpop.xlane.xlu0 %103  ;;  %v3432_v40 = vpop.eup %2705  ;;  %v348_v5 = vand.u32 4294901760, %v347_v10  ;;  %824 = vmatprep.mubr.f32.mxu1 %v3395_v59  ;;  %v3437_v31 = vand.u32 4294901760, %v3398_v25  ;;  %v190_v32 = vmul.f32 1.442695, %v139_v1  ;;  %2589 = vmatpush3.bf16.msra.mxu1 %v4459_v42  ;;  %2721 = vpow2.f32 %v188_v41 }
  0xd1   :  { %v3440_v16 = vpop.eup %2707  ;;  %v368_v49 = vsub.f32 %v3411_v13, %v4277_v14  ;;  %v3447_v10 = vsub.f32 %v2690_v0, %v3408_v43  ;;  %v4461_v59 = vld [vmem:[#allocation40_spill] sm:$0xff]  ;;  %v4462_v1 = vand.u32 4294901760, %v3421_v48  ;;  %v3456_v30 = vand.u32 4294901760, %v3425_v62  ;;  %v4464_v41 = vld [vmem:[#allocation26_spill] sm:$0xff] }
  0xd2   :  { %4458 = vst [vmem:[#allocation23_spill] sm:$0xff] %v3437_v31  ;;  %2591 = vmatprep.subr.bf16.mxu1 %v4461_v59  ;;  %v3450_v35 = vpop.eup %2709  ;;  %349 = vmatprep.mubr.f32.mxu0 %v348_v5  ;;  %v3459_v14 = vsub.f32 %v2700_v4, %v3423_v3  ;;  %v140_v28 = vsub.f32 %v4464_v41, %v104_v24  ;;  %v4465_v5 = vand.u32 4294901760, %v3430_v15  ;;  %v107_v2 = vpop.xlane.xlu1 %106  ;;  %2723 = vpow2.f32 %v190_v32  ;;  %v4471_v32 = vld [vmem:[#allocation41_spill] sm:$0xff] }
  0xd3   :  { %4460 = vst [vmem:[#allocation24_spill] sm:$0xff] %v3447_v10  ;;  %v362_v42 = vsub.f32 %v3421_v48, %v4462_v1  ;;  %4463 = vst [vmem:[#allocation25_spill] sm:$0xff] %v3456_v30  ;;  %v3462_v13 = vpop.eup %2711  ;;  %355 = vmatmul.mubr.f32.vlgmr.msra.gmra.mrb[0].mxu0 %v354_v8  ;;  %826 = vmatmul.mubr.f32.gmra.mrb[4].mxu1 %v3408_v43  ;;  %v369_v0 = vand.u32 4294901760, %v368_v49  ;;  %v4288_v1 = vand.u32 4294901760, %v3447_v10  ;;  %v4466_v48 = vld [vmem:[#allocation27_spill] sm:$0xff] }
  0xd4   :  { %v377_v59 = vsub.f32 %v3430_v15, %v4465_v5  ;;  %v141_v39 = vsub.f32 %v4466_v48, %v104_v24  ;;  %v3470_v55 = vpop.eup %2713  ;;  %v4467_v4 = vpack.c.bf16 %v2984_v11, %v2982_v7  ;;  %831 = vmatprep.mubr.f32.mxu1 %v3423_v3  ;;  %v4294_v8 = vand.u32 4294901760, %v3459_v14  ;;  %2593 = vmatpush3.bf16.msra.mxu1 %v4471_v32  ;;  %v4473_v3 = vld [vmem:[#allocation28_spill] sm:$0xff] }
  0xd5   :  { %v363_v41 = vand.u32 4294901760, %v362_v42  ;;  %v192_v49 = vmul.f32 1.442695, %v140_v28  ;;  %v4468_v5 = vpack.c.bf16 %v2991_v44, %v2988_v29  ;;  %v383_v24 = vsub.f32 %v3447_v10, %v4288_v1  ;;  %v110_v32 = vpop.xlane.xlu0 %109 }
  0xd6   :  { %2553 = vmatpush3.bf16.msra.mxu0 %v4467_v4  ;;  %v3484_v48 = vand.u32 4294901760, %v3414_v6  ;;  %v194_v43 = vmul.f32 1.442695, %v141_v39  ;;  %v3488_v42 = vsub.f32 %v3398_v25, %v3437_v31  ;;  %v3491_v4 = vpop.eup %2715  ;;  %v378_v28 = vand.u32 4294901760, %v377_v59  ;;  %v4474_v39 = vld [vmem:[#allocation42_spill] sm:$0xff] }
  0xd7   :  { %2555 = vmatprep.subr.bf16.mxu0 %v4468_v5  ;;  %364 = vmatprep.mubr.f32.mxu0 %v363_v41  ;;  %v392_v5 = vsub.f32 %v3459_v14, %v4294_v8  ;;  %v3497_v1 = vand.u32 4294901760, %v3440_v16  ;;  %v142_v10 = vsub.f32 %v4473_v3, %v107_v2  ;;  %v3501_v44 = vpop.eup %2717  ;;  %2725 = vpow2.f32 %v192_v49  ;;  %v4476_v41 = vld [vmem:[#allocation29_spill] sm:$0xff] }
  0xd8   :  { %4469 = vst [vmem:[#allocation26_spill] sm:$0xff] %v3484_v48  ;;  %4470 = vst [vmem:[#allocation27_spill] sm:$0xff] %v3488_v42  ;;  %2595 = vmatprep.subr.bf16.mxu1 %v4474_v39  ;;  %370 = vmatmul.mubr.f32.gmra.mrb[2].mxu0 %v369_v0  ;;  %v3506_v59 = vand.u32 4294901760, %v3432_v40  ;;  %v143_v8 = vsub.f32 %v4476_v41, %v107_v2  ;;  %v384_v3 = vand.u32 4294901760, %v383_v24  ;;  %2727 = vpow2.f32 %v194_v43 }
  0xd9   :  { %4472 = vst [vmem:[#allocation52_spill] sm:$0xff] %v3497_v1  ;;  %833 = vmatmul.mubr.f32.gmra.mrb[6].mxu1 %v3437_v31  ;;  %379 = vmatprep.mubr.f32.mxu0 %v378_v28  ;;  %v196_v39 = vmul.f32 1.442695, %v142_v10  ;;  %v3512_v0 = vsub.f32 %v3425_v62, %v3456_v30  ;;  %v3514_v31 = vpop.eup %2719  ;;  %v4477_v49 = vpack.c.bf16 %v2999_v47, %v2994_v52  ;;  %v393_v25 = vand.u32 4294901760, %v392_v5  ;;  %v4480_v10 = vld [vmem:[#allocation43_spill] sm:$0xff] }
  0xda   :  { %4475 = vst [vmem:[#allocation28_spill] sm:$0xff] %v3506_v59  ;;  %838 = vmatprep.mubr.f32.mxu1 %v3456_v30  ;;  %v4478_v2 = vand.u32 4294901760, %v3488_v42  ;;  %v198_v41 = vmul.f32 1.442695, %v143_v8  ;;  %v3524_v43 = vsub.f32 %v3414_v6, %v3484_v48  ;;  %2597 = vmatpush3.bf16.msra.mxu1 %v4480_v10  ;;  %v3529_v24 = vand.u32 4294901760, %v3462_v13  ;;  %v4484_v8 = vld [vmem:[#allocation30_spill] sm:$0xff]  ;;  %v3540_v6 = vpop.eup %2721 }
  0xdb   :  { %2557 = vmatpush3.bf16.msra.mxu0 %v4477_v49  ;;  %v4482_v49 = vpack.c.bf16 %v3069_v51, %v3066_v50  ;;  %v3536_v5 = vsub.f32 %v3440_v16, %v3497_v1  ;;  %v4485_v30 = vld [vmem:[#allocation44_spill] sm:$0xff]  ;;  %2729 = vpow2.f32 %v196_v39  ;;  %v3545_v10 = vand.u32 4294901760, %v3450_v35  ;;  %v113_v51 = vpop.xlane.xlu1 %112 }
  0xdc   :  { %v398_v28 = vsub.f32 %v3488_v42, %v4478_v2  ;;  %4479 = vst [vmem:[#allocation29_spill] sm:$0xff] %v3524_v43  ;;  %4481 = vst [vmem:[#allocation53_spill] sm:$0xff] %v3529_v24  ;;  %v144_v2 = vsub.f32 %v4484_v8, %v110_v32  ;;  %2599 = vmatprep.subr.bf16.mxu1 %v4485_v30  ;;  %385 = vmatmul.mubr.f32.gmra.mrb[4].mxu0 %v384_v3  ;;  %v4304_v62 = vand.u32 4294901760, %v3524_v43 }
  0xdd   :  { %2559 = vmatprep.subr.bf16.mxu0 %v4482_v49  ;;  %4483 = vst [vmem:[#allocation54_spill] sm:$0xff] %v3536_v5  ;;  %840 = vmatmul.mubr.f32.gmra.mrb[8].mxu1 %v3484_v48  ;;  %4486 = vst [vmem:[#allocation30_spill] sm:$0xff] %v3545_v10  ;;  %v4487_v49 = vld [vmem:[#allocation31_spill] sm:$0xff]  ;;  %v4488_v8 = vand.u32 4294901760, %v3512_v0  ;;  %2731 = vpow2.f32 %v198_v41  ;;  %v4491_v41 = vand.u32 4294901760, %v3536_v5 }
  0xde   :  { %v145_v42 = vsub.f32 %v4487_v49, %v110_v32  ;;  %394 = vmatprep.mubr.f32.mxu0 %v393_v25  ;;  %845 = vmatprep.mubr.f32.mxu1 %v3497_v1  ;;  %v399_v16 = vand.u32 4294901760, %v398_v28  ;;  %v200_v48 = vmul.f32 1.442695, %v144_v2  ;;  %v413_v39 = vsub.f32 %v3524_v43, %v4304_v62  ;;  %v4490_v49 = vld [vmem:[#allocation45_spill] sm:$0xff]  ;;  %v4493_v1 = vld [vmem:[#allocation32_spill] sm:$0xff] }
  0xdf   :  { %v407_v30 = vsub.f32 %v3512_v0, %v4488_v8  ;;  %v4489_v32 = vpack.c.bf16 %v3076_v60, %v3072_v57  ;;  %v3561_v28 = vsub.f32 %v3432_v40, %v3506_v59  ;;  %2601 = vmatpush3.bf16.msra.mxu1 %v4490_v49  ;;  %v3564_v8 = vpop.eup %2723  ;;  %v422_v2 = vsub.f32 %v3536_v5, %v4491_v41  ;;  %v4495_v40 = vld [vmem:[#allocation46_spill] sm:$0xff]  ;;  %v4497_v41 = vld [vmem:[#allocation33_spill] sm:$0xff]  ;;  %v116_v5 = vpop.xlane.xlu0 %115 }
  0xe0   :  { %v202_v25 = vmul.f32 1.442695, %v145_v42  ;;  %v3570_v62 = vand.u32 4294901760, %v3491_v4  ;;  %v146_v43 = vsub.f32 %v4493_v1, %v113_v51  ;;  %v4494_v42 = vpack.c.bf16 %v3096_v46, %v3089_v58  ;;  %2603 = vmatprep.subr.bf16.mxu1 %v4495_v40  ;;  %400 = vmatmul.mubr.f32.gmra.mrb[6].mxu0 %v399_v16 }
  0xe1   :  { %2561 = vmatpush3.bf16.msra.mxu0 %v4489_v32  ;;  %v408_v3 = vand.u32 4294901760, %v407_v30  ;;  %847 = vmatmul.mubr.f32.gmra.mrb[10].mxu1 %v3506_v59  ;;  %2733 = vpow2.f32 %v200_v48  ;;  %v4314_v30 = vand.u32 4294901760, %v3561_v28  ;;  %v3580_v32 = vand.u32 4294901760, %v3470_v55  ;;  %v3588_v59 = vpop.eup %2725 }
  0xe2   :  { %4492 = vst [vmem:[#allocation31_spill] sm:$0xff] %v3570_v62  ;;  %2563 = vmatprep.subr.bf16.mxu0 %v4494_v42  ;;  %v147_v49 = vsub.f32 %v4497_v41, %v113_v51  ;;  %852 = vmatprep.mubr.f32.mxu1 %v3529_v24  ;;  %v414_v1 = vand.u32 4294901760, %v413_v39  ;;  %2735 = vpow2.f32 %v202_v25  ;;  %v204_v42 = vmul.f32 1.442695, %v146_v43  ;;  %v4499_v43 = vld [vmem:[#allocation47_spill] sm:$0xff] }
  0xe3   :  { %4496 = vst [vmem:[#allocation32_spill] sm:$0xff] %v3580_v32  ;;  %409 = vmatprep.mubr.f32.mxu0 %v408_v3  ;;  %v3586_v16 = vsub.f32 %v3462_v13, %v3529_v24  ;;  %v423_v48 = vand.u32 4294901760, %v422_v2  ;;  %v428_v40 = vsub.f32 %v3561_v28, %v4314_v30  ;;  %v3595_v51 = vsub.f32 %v3450_v35, %v3545_v10  ;;  %v3601_v13 = vpop.eup %2727  ;;  %v2751_v2 = vld [vmem:[#allocation2 + $0xe0] sm:$0xff]  ;;  %v2752_v39 = vld [vmem:[#allocation2 + $0xe8] sm:$0xff]  ;;  %v119_v24 = vpop.xlane.xlu1 %118 }
  0xe4   :  { %v206_v46 = vmul.f32 1.442695, %v147_v49  ;;  %v4498_v3 = vpack.c.bf16 %v3106_v54, %v3101_v34  ;;  %2605 = vmatpush3.bf16.msra.mxu1 %v4499_v43  ;;  %v3605_v25 = vand.u32 4294901760, %v3514_v31  ;;  %v3609_v49 = vsub.f32 %v3491_v4, %v3570_v62  ;;  %415 = vmatmul.mubr.f32.gmra.mrb[8].mxu0 %v414_v1 }
  0xe5   :  { %v148_v35 = vsub.f32 %v2751_v2, %v116_v5  ;;  %v4501_v41 = vpack.c.bf16 %v3174_v17, %v3171_v56  ;;  %2607 = vmatprep.subr.bf16.mxu1 %v3308_v9  ;;  %854 = vmatmul.mubr.f32.gmra.mrb[12].mxu1 %v3545_v10  ;;  %2737 = vpow2.f32 %v204_v42  ;;  %v3618_v30 = vand.u32 4294901760, %v3501_v44  ;;  %v3625_v42 = vpop.eup %2729 }
  0xe6   :  { %2565 = vmatpush3.bf16.msra.mxu0 %v4498_v3  ;;  %4500 = vst [vmem:[#allocation33_spill] sm:$0xff] %v3605_v25  ;;  %v4320_v3 = vand.u32 4294901760, %v3595_v51  ;;  %v149_v4 = vsub.f32 %v2752_v39, %v116_v5  ;;  %424 = vmatprep.mubr.f32.mxu0 %v423_v48  ;;  %v429_v2 = vand.u32 4294901760, %v428_v40  ;;  %v4321_v1 = vand.u32 4294901760, %v3609_v49 }
  0xe7   :  { %2567 = vmatprep.subr.bf16.mxu0 %v4501_v41  ;;  %4502 = vst [vmem:[#allocation55_spill] sm:$0xff] %v3618_v30  ;;  %859 = vmatprep.mubr.f32.mxu1 %v3570_v62  ;;  %v4503_v41 = vand.u32 4294901760, %v3586_v16  ;;  %v208_v10 = vmul.f32 1.442695, %v148_v35  ;;  %2739 = vpow2.f32 %v206_v46  ;;  %v3632_v48 = vsub.f32 %v3470_v55, %v3580_v32 }
  0xe8   :  { %v443_v43 = vsub.f32 %v3595_v51, %v4320_v3  ;;  %v210_v5 = vmul.f32 1.442695, %v149_v4  ;;  %v4504_v40 = vpack.c.bf16 %v3180_v18, %v3177_v37  ;;  %2609 = vmatpush3.bf16.msra.mxu1 %v3310_v33  ;;  %v452_v46 = vsub.f32 %v3609_v49, %v4321_v1  ;;  %v2732_v3 = vpop.eup %2731  ;;  %430 = vmatmul.mubr.f32.gmra.mrb[10].mxu0 %v429_v2  ;;  %v2754_v1 = vld [vmem:[#allocation2 + $0xf8] sm:$0xff] }
  0xe9   :  { %v437_v9 = vsub.f32 %v3586_v16, %v4503_v41  ;;  %v3642_v35 = vand.u32 4294901760, %v3564_v8  ;;  %v2753_v41 = vld [vmem:[#allocation2 + $0xf0] sm:$0xff]  ;;  %v4506_v55 = vpack.c.bf16 %v3201_v45, %v3191_v61  ;;  %2611 = vmatprep.subr.bf16.mxu1 %v3316_v38  ;;  %861 = vmatmul.mubr.f32.gmra.mrb[14].mxu1 %v3580_v32  ;;  %2741 = vpow2.f32 %v208_v10 }
  0xea   :  { %2569 = vmatpush3.bf16.msra.mxu0 %v4504_v40  ;;  %v150_v4 = vsub.f32 %v2753_v41, %v119_v24  ;;  %v3651_v40 = vand.u32 4294901760, %v3540_v6  ;;  %v151_v62 = vsub.f32 %v2754_v1, %v119_v24  ;;  %866 = vmatprep.mubr.f32.mxu1 %v3605_v25  ;;  %v444_v41 = vand.u32 4294901760, %v443_v43 }
  0xeb   :  { %v438_v39 = vand.u32 4294901760, %v437_v9  ;;  %4505 = vst [vmem:[#allocation56_spill] sm:$0xff] %v3642_v35  ;;  %2571 = vmatprep.subr.bf16.mxu0 %v4506_v55  ;;  %v4329_v9 = vand.u32 4294901760, %v3632_v48  ;;  %2743 = vpow2.f32 %v210_v5  ;;  %v3656_v55 = vsub.f32 %v3514_v31, %v3605_v25  ;;  %v3661_v10 = vpop.eup %2733 }
  0xec   :  { %4507 = vst [vmem:[#allocation57_spill] sm:$0xff] %v3651_v40  ;;  %v3659_v2 = vand.u32 4294901760, %v3601_v13  ;;  %v214_v38 = vmul.f32 1.442695, %v151_v62  ;;  %v3668_v24 = vsub.f32 %v3501_v44, %v3618_v30  ;;  %v3671_v43 = vand.u32 4294901760, %v3588_v59  ;;  %2613 = vmatpush3.bf16.msra.mxu1 %v3319_v12  ;;  %v2736_v1 = vpop.eup %2735 }
  0xed   :  { %439 = vmatprep.mubr.f32.mxu0 %v438_v39  ;;  %v458_v32 = vsub.f32 %v3632_v48, %v4329_v9  ;;  %v4511_v31 = vpack.c.bf16 %v3223_v20, %v3204_v36  ;;  %v453_v5 = vand.u32 4294901760, %v452_v46  ;;  %v212_v39 = vmul.f32 1.442695, %v150_v4  ;;  %2647 = vmatprep.subr.bf16.mxu1 %v3035_v19 }
  0xee   :  { %4508 = vst [vmem:[#allocation58_spill] sm:$0xff] %v3659_v2  ;;  %4509 = vst [vmem:[#allocation59_spill] sm:$0xff] %v3668_v24  ;;  %v4330_v25 = vand.u32 4294901760, %v3656_v55  ;;  %v3680_v62 = vsub.f32 %v3564_v8, %v3642_v35  ;;  %v4513_v44 = vpack.c.bf16 %v3261_v23, %v3256_v22  ;;  %445 = vmatmul.mubr.f32.gmra.mrb[12].mxu0 %v444_v41  ;;  %868 = vmatmul.mubr.f32.gmra.mrb[16].mxu1 %v3618_v30 }
  0xef   :  { %4510 = vst [vmem:[#allocation60_spill] sm:$0xff] %v3671_v43  ;;  %2573 = vmatpush3.bf16.msra.mxu0 %v4511_v31  ;;  %v459_v31 = vand.u32 4294901760, %v458_v32  ;;  %v4333_v9 = vand.u32 4294901760, %v3668_v24  ;;  %v3688_v46 = vand.u32 4294901760, %v2732_v3  ;;  %v3692_v4 = vsub.f32 %v3540_v6, %v3651_v40  ;;  %454 = vmatprep.mubr.f32.mxu0 %v453_v5  ;;  %v2738_v41 = vpop.eup %2737 }
  0xf0   :  { %4512 = vst [vmem:[#allocation61_spill] sm:$0xff] %v3680_v62  ;;  %2575 = vmatprep.subr.bf16.mxu0 %v4513_v44  ;;  %873 = vmatprep.mubr.f32.mxu1 %v3642_v35  ;;  %2745 = vpow2.f32 %v214_v38  ;;  %v467_v19 = vsub.f32 %v3656_v55, %v4330_v25  ;;  %v4338_v8 = vand.u32 4294901760, %v3680_v62  ;;  %v3701_v32 = vsub.f32 %v3601_v13, %v3659_v2 }
  0xf1   :  { %4514 = vst [vmem:[#allocation62_spill] sm:$0xff] %v3688_v46  ;;  %4515 = vst [vmem:[#allocation63_spill] sm:$0xff] %v3692_v4  ;;  %v473_v6 = vsub.f32 %v3668_v24, %v4333_v9  ;;  %v3708_v44 = vand.u32 4294901760, %v3625_v42  ;;  %v3712_v38 = vsub.f32 %v3588_v59, %v3671_v43  ;;  %v4518_v25 = vpack.c.bf16 %v3267_v63, %v3264_v26  ;;  %v2740_v24 = vpop.eup %2739 }
  0xf2   :  { %4516 = vst [vmem:[#allocation64_spill] sm:$0xff] %v3701_v32  ;;  %v468_v13 = vand.u32 4294901760, %v467_v19  ;;  %v482_v35 = vsub.f32 %v3680_v62, %v4338_v8  ;;  %v3721_v30 = vand.u32 4294901760, %v2736_v1  ;;  %v4520_v5 = vpack.c.bf16 %v3280_v27, %v3274_v53  ;;  %460 = vmatmul.mubr.f32.gmra.mrb[14].mxu0 %v459_v31  ;;  %875 = vmatmul.mubr.f32.gmra.mrb[18].mxu1 %v3651_v40  ;;  %v4528_v31 = vld [vmem:[#allocation14_spill] sm:$0xff] }
  0xf3   :  { %4517 = vst [vmem:[#allocation65_spill] sm:$0xff] %v3708_v44  ;;  %2577 = vmatpush3.bf16.msra.mxu0 %v4518_v25  ;;  %2747 = vpow2.f32 %v212_v39  ;;  %v3728_v59 = vsub.f32 %v2732_v3, %v3688_v46  ;;  %880 = vmatprep.mubr.f32.mxu1 %v3659_v2  ;;  %v4522_v25 = vand.u32 4294901760, %v3692_v4  ;;  %v2742_v9 = vpop.eup %2741  ;;  %v474_v62 = vand.u32 4294901760, %v473_v6  ;;  %v4524_v39 = vld [vmem:[#allocation48_spill] sm:$0xff] }
  0xf4   :  { %4519 = vst [vmem:[#allocation66_spill] sm:$0xff] %v3721_v30  ;;  %2579 = vmatprep.subr.bf16.mxu0 %v4520_v5  ;;  %469 = vmatprep.mubr.f32.mxu0 %v468_v13  ;;  %v3736_v5 = vand.u32 4294901760, %v3661_v10  ;;  %v3741_v3 = vsub.f32 %v3625_v42, %v3708_v44  ;;  %v4525_v13 = vpack.c.bf16 %v3296_v21, %v4524_v39  ;;  %v483_v40 = vand.u32 4294901760, %v482_v35 }
  0xf5   :  { %4521 = vst [vmem:[#allocation67_spill] sm:$0xff] %v3728_v59  ;;  %v488_v19 = vsub.f32 %v3692_v4, %v4522_v25  ;;  %v2744_v2 = vpop.eup %2743  ;;  %v4526_v25 = vand.u32 4294901760, %v3701_v32  ;;  %v3749_v6 = vand.u32 4294901760, %v2740_v24  ;;  %v3752_v4 = vsub.f32 %v2736_v1, %v3721_v30 }
  0xf6   :  { %4523 = vst [vmem:[#allocation68_spill] sm:$0xff] %v3736_v5  ;;  %475 = vmatmul.mubr.f32.gmra.mrb[16].mxu0 %v474_v62  ;;  %882 = vmatmul.mubr.f32.gmra.mrb[20].mxu1 %v3671_v43  ;;  %v4529_v35 = vand.u32 4294901760, %v3712_v38  ;;  %v3764_v21 = vand.u32 4294901760, %v2738_v41  ;;  %v3768_v62 = vsub.f32 %v3661_v10, %v3736_v5  ;;  %v3778_v1 = vand.u32 4294901760, %v2742_v9 }
  0xf7   :  { %2581 = vmatpush3.bf16.msra.mxu0 %v4525_v13  ;;  %v497_v8 = vsub.f32 %v3701_v32, %v4526_v25  ;;  %4527 = vst [vmem:[#allocation48_spill] sm:$0xff] %v3749_v6  ;;  %484 = vmatprep.mubr.f32.mxu0 %v483_v40  ;;  %v489_v42 = vand.u32 4294901760, %v488_v19  ;;  %v4530_v25 = vand.u32 4294901760, %v3728_v59 }
  0xf8   :  { %2615 = vmatprep.subr.bf16.mxu0 %v4528_v31  ;;  %887 = vmatprep.mubr.f32.mxu1 %v3688_v46  ;;  %v503_v13 = vsub.f32 %v3712_v38, %v4529_v35  ;;  %v3771_v46 = vand.u32 4294901760, %v2744_v2  ;;  %v3774_v35 = vsub.f32 %v2740_v24, %v3749_v6  ;;  %4531 = vst [vmem:[#allocation14_spill] sm:$0xff] %v3778_v1 }
  0xf9   :  { %v512_v32 = vsub.f32 %v3728_v59, %v4530_v25  ;;  %v498_v31 = vand.u32 4294901760, %v497_v8  ;;  %v4532_v8 = vand.u32 4294901760, %v3741_v3  ;;  %v4364_v59 = vand.u32 4294901760, %v3768_v62 }
  0xfa   :  { %v2746_v40 = vpop.eup %2745  ;;  %490 = vmatmul.mubr.f32.gmra.mrb[18].mxu0 %v489_v42  ;;  %889 = vmatmul.mubr.f32.gmra.mrb[22].mxu1 %v3708_v44  ;;  %v504_v25 = vand.u32 4294901760, %v503_v13  ;;  %v3785_v24 = vsub.f32 %v2738_v41, %v3764_v21  ;;  %v4533_v42 = vand.u32 4294901760, %v3752_v4  ;;  %v3794_v44 = vsub.f32 %v2744_v2, %v3771_v46 }
  0xfb   :  { %499 = vmatprep.mubr.f32.mxu0 %v498_v31  ;;  %894 = vmatprep.mubr.f32.mxu1 %v3721_v30  ;;  %v513_v43 = vand.u32 4294901760, %v512_v32  ;;  %v518_v19 = vsub.f32 %v3741_v3, %v4532_v8  ;;  %v3791_v13 = vand.u32 4294901760, %v2746_v40  ;;  %v533_v8 = vsub.f32 %v3768_v62, %v4364_v59 }
  0xfc   :  { %v527_v31 = vsub.f32 %v3752_v4, %v4533_v42  ;;  %v4366_v42 = vand.u32 4294901760, %v3785_v24  ;;  %v3805_v30 = vsub.f32 %v2742_v9, %v3778_v1 }
  0xfd   :  { %v2748_v10 = vpop.eup %2747  ;;  %4534 = vst [vmem:[#allocation69_spill] sm:$0xff] %v3791_v13  ;;  %v519_v41 = vand.u32 4294901760, %v518_v19  ;;  %v534_v19 = vand.u32 4294901760, %v533_v8 }
  0xfe   :  { %505 = vmatmul.mubr.f32.gmra.mrb[20].mxu0 %v504_v25  ;;  %896 = vmatmul.mubr.f32.gmra.mrb[24].mxu1 %v3736_v5  ;;  %v3798_v32 = vand.u32 4294901760, %v2748_v10  ;;  %v528_v2 = vand.u32 4294901760, %v527_v31  ;;  %v4536_v25 = vand.u32 4294901760, %v3774_v35  ;;  %v548_v9 = vsub.f32 %v3785_v24, %v4366_v42 }
  0xff   :  { %514 = vmatprep.mubr.f32.mxu0 %v513_v43  ;;  %901 = vmatprep.mubr.f32.mxu1 %v3749_v6  ;;  %v4365_v43 = vand.u32 4294901760, %v3794_v44  ;;  %v3812_v6 = vsub.f32 %v2746_v40, %v3791_v13  ;;  %v4367_v31 = vand.u32 4294901760, %v3805_v30 }
 0x100   :  { %4535 = vst [vmem:[#allocation70_spill] sm:$0xff] %v3798_v32  ;;  %v542_v5 = vsub.f32 %v3774_v35, %v4536_v25  ;;  %v3821_v25 = vsub.f32 %v2748_v10, %v3798_v32  ;;  %v549_v8 = vand.u32 4294901760, %v548_v9 }
 0x101   :  { %v557_v40 = vsub.f32 %v3794_v44, %v4365_v43 }
 0x102   :  { %520 = vmatmul.mubr.f32.gmra.mrb[22].mxu0 %v519_v41  ;;  %903 = vmatmul.mubr.f32.gmra.mrb[26].mxu1 %v3764_v21  ;;  %v543_v59 = vand.u32 4294901760, %v542_v5  ;;  %v4372_v41 = vand.u32 4294901760, %v3812_v6  ;;  %v4375_v10 = vand.u32 4294901760, %v3821_v25 }
 0x103   :  { %529 = vmatprep.mubr.f32.mxu0 %v528_v2  ;;  %908 = vmatprep.mubr.f32.mxu1 %v3771_v46  ;;  %v563_v2 = vsub.f32 %v3805_v30, %v4367_v31  ;;  %v558_v5 = vand.u32 4294901760, %v557_v40 }
 0x104   :  { %v572_v43 = vsub.f32 %v3812_v6, %v4372_v41  ;;  %v578_v9 = vsub.f32 %v3821_v25, %v4375_v10 }
 0x105   :  { %v564_v42 = vand.u32 4294901760, %v563_v2  ;;  %v4545_v2 = vld [vmem:[#allocation20_spill] sm:$0xff] }
 0x106   :  { %535 = vmatmul.mubr.f32.gmra.mrb[24].mxu0 %v534_v19  ;;  %910 = vmatmul.mubr.f32.gmra.mrb[28].mxu1 %v3778_v1  ;;  %v4537_v19 = vld [vmem:[#allocation15_spill] sm:$0xff]  ;;  %v573_v31 = vand.u32 4294901760, %v572_v43  ;;  %v4541_v1 = vld [vmem:[#allocation21_spill] sm:$0xff]  ;;  %v4548_v43 = vand.u32 4294901760, %v2982_v7  ;;  %v4557_v7 = vand.u32 4294901760, %v3459_v14 }
 0x107   :  { %544 = vmatprep.mubr.f32.mxu0 %v543_v59  ;;  %915 = vmatprep.mubr.f32.mxu1 %v3791_v13  ;;  %v4538_v59 = vand.u32 4294901760, %v4537_v19  ;;  %v4539_v13 = vld [vmem:[#allocation13_spill] sm:$0xff]  ;;  %v4542_v41 = vand.u32 4294901760, %v4541_v1 }
 0x108   :  { %v4540_v40 = vand.u32 4294901760, %v4539_v13 }
 0x10a   :  { %550 = vmatmul.mubr.f32.gmra.mrb[26].mxu0 %v549_v8  ;;  %917 = vmatmul.mubr.f32.gmra.mrb[30].mxu1 %v3798_v32  ;;  %v579_v8 = vand.u32 4294901760, %v578_v9  ;;  %v4543_v32 = vld [vmem:[#allocation35_spill] sm:$0xff]  ;;  %v4551_v9 = vld [vmem:[#allocation34_spill] sm:$0xff] }
 0x10b   :  { %559 = vmatprep.mubr.f32.mxu0 %v558_v5  ;;  %1294 = vmatprep.mubr.f32.mxu1 %v4538_v59  ;;  %v4544_v5 = vld [vmem:[#allocation36_spill] sm:$0xff]  ;;  %v4546_v59 = vand.u32 4294901760, %v4545_v2 }
 0x10e   :  { %565 = vmatmul.mubr.f32.gmra.mrb[28].mxu0 %v564_v42  ;;  %1298 = vmatmul.mubr.f32.vlgmr.msra.gmra.mrb[32].mxu1 %v4540_v40  ;;  %v4547_v42 = vand.u32 4294901760, %v3430_v15 }
 0x10f   :  { %574 = vmatprep.mubr.f32.mxu0 %v573_v31  ;;  %1305 = vmatprep.mubr.f32.mxu1 %v4542_v41  ;;  %v4549_v31 = vand.u32 4294901760, %v2984_v11  ;;  %v4550_v41 = vand.u32 4294901760, %v2988_v29  ;;  %v4558_v11 = vand.u32 4294901760, %v2994_v52  ;;  %v4559_v29 = vand.u32 4294901760, %v2999_v47 }
 0x110   :  { %2649 = vmatpush3.bf16.msra.mxu1 %v4543_v32  ;;  %v4552_v32 = vand.u32 4294901760, %v4551_v9  ;;  %v4563_v9 = vld [vmem:[#allocation41_spill] sm:$0xff]  ;;  %v4567_v47 = vand.u32 4294901760, %v3072_v57  ;;  %v4568_v52 = vand.u32 4294901760, %v3076_v60  ;;  %v4576_v57 = vld [vmem:[#allocation54_spill] sm:$0xff] }
 0x111   :  { %2651 = vmatprep.subr.bf16.mxu1 %v4544_v5  ;;  %v2616_v40 = vpack.c.bf16 %v4549_v31, %v4548_v43  ;;  %v4553_v5 = vld [vmem:[#allocation37_spill] sm:$0xff]  ;;  %v4560_v43 = vand.u32 4294901760, %v3066_v50  ;;  %v4561_v31 = vld [vmem:[#allocation38_spill] sm:$0xff]  ;;  %v4577_v60 = vand.u32 4294901760, %v4576_v57 }
 0x112   :  { %580 = vmatmul.mubr.f32.gmra.mrb[30].mxu0 %v579_v8  ;;  %1309 = vmatmul.mubr.f32.gmra.mrb[34].mxu1 %v4546_v59  ;;  %v2618_v10 = vpack.c.bf16 %v4552_v32, %v4550_v41  ;;  %v4554_v8 = vld [vmem:[#allocation40_spill] sm:$0xff]  ;;  %v4562_v41 = vand.u32 4294901760, %v4561_v31  ;;  %v2624_v50 = vpack.c.bf16 %v4568_v52, %v4567_v47  ;;  %v4569_v32 = vld [vmem:[#allocation42_spill] sm:$0xff]  ;;  %v4581_v31 = vand.u32 4294901760, %v3171_v56  ;;  %v4591_v47 = vld [vmem:[#allocation47_spill] sm:$0xff] }
 0x113   :  { %1052 = vmatprep.mubr.f32.mxu0 %v4537_v19  ;;  %1316 = vmatprep.mubr.f32.mxu1 %v4547_v42  ;;  %v4555_v19 = vld [vmem:[#allocation24_spill] sm:$0xff]  ;;  %v2620_v42 = vpack.c.bf16 %v4559_v29, %v4558_v11  ;;  %v4578_v29 = vand.u32 4294901760, %v3101_v34  ;;  %v4585_v34 = vand.u32 4294901760, %v3586_v16  ;;  %v4587_v56 = vand.u32 4294901760, %v3180_v18 }
 0x114   :  { %2653 = vmatpush3.bf16.msra.mxu1 %v4553_v5  ;;  %v4556_v59 = vand.u32 4294901760, %v4555_v19  ;;  %v4570_v5 = vand.u32 4294901760, %v3089_v58  ;;  %v4579_v58 = vand.u32 4294901760, %v3106_v54  ;;  %v4586_v54 = vand.u32 4294901760, %v3177_v37 }
 0x115   :  { %2655 = vmatprep.subr.bf16.mxu1 %v4554_v8  ;;  %v4593_v37 = vand.u32 4294901760, %v3609_v49  ;;  %v4594_v18 = vand.u32 4294901760, %v3204_v36  ;;  %v4601_v36 = vand.u32 4294901760, %v3264_v26  ;;  %v4608_v26 = vld [vmem:[#allocation61_spill] sm:$0xff] }
 0x116   :  { %1055 = vmatmul.mubr.f32.vlgmr.msra.gmra.mrb[32].mxu0 %v4539_v13  ;;  %1320 = vmatmul.mubr.f32.gmra.mrb[36].mxu1 %v4556_v59  ;;  %v2622_v13 = vpack.c.bf16 %v4562_v41, %v4560_v43  ;;  %v4580_v43 = vld [vmem:[#allocation44_spill] sm:$0xff] }
 0x117   :  { %2617 = vmatpush3.bf16.msra.mxu0 %v2616_v40  ;;  %1061 = vmatprep.mubr.f32.mxu0 %v4541_v1  ;;  %v4564_v40 = vld [vmem:[#allocation27_spill] sm:$0xff] }
 0x118   :  { %1327 = vmatprep.mubr.f32.mxu1 %v4557_v7  ;;  %2619 = vmatprep.subr.bf16.mxu0 %v2618_v10  ;;  %v4565_v1 = vand.u32 4294901760, %v4564_v40  ;;  %v4566_v10 = vand.u32 4294901760, %v3512_v0  ;;  %v4573_v7 = vld [vmem:[#allocation43_spill] sm:$0xff] }
 0x119   :  { %2657 = vmatpush3.bf16.msra.mxu1 %v4563_v9  ;;  %v2632_v9 = vpack.c.bf16 %v4587_v56, %v4586_v54  ;;  %v4641_v54 = vld [vmem:[#allocation53_spill] sm:$0xff]  ;;  %v4642_v56 = vld [vmem:[#allocation30_spill] sm:$0xff] }
 0x11a   :  { %1064 = vmatmul.mubr.f32.gmra.mrb[34].mxu0 %v4545_v2  ;;  %1331 = vmatmul.mubr.f32.gmra.mrb[38].mxu1 %v4565_v1  ;;  %v4571_v2 = vld [vmem:[#allocation39_spill] sm:$0xff]  ;;  %v4589_v1 = vand.u32 4294901760, %v3191_v61  ;;  %v4595_v61 = vand.u32 4294901760, %v3223_v20  ;;  %v4600_v20 = vand.u32 4294901760, %v3656_v55 }
 0x11b   :  { %1070 = vmatprep.mubr.f32.mxu0 %v3430_v15  ;;  %1338 = vmatprep.mubr.f32.mxu1 %v4566_v10  ;;  %v4572_v8 = vand.u32 4294901760, %v4571_v2  ;;  %v4574_v15 = vld [vmem:[#allocation29_spill] sm:$0xff]  ;;  %v4599_v2 = vand.u32 4294901760, %v3632_v48 }
 0x11c   :  { %2621 = vmatpush3.bf16.msra.mxu0 %v2620_v42  ;;  %2659 = vmatprep.subr.bf16.mxu1 %v4569_v32  ;;  %v4575_v11 = vand.u32 4294901760, %v4574_v15  ;;  %v2628_v42 = vpack.c.bf16 %v4579_v58, %v4578_v29  ;;  %v2636_v52 = vpack.c.bf16 %v4595_v61, %v4594_v18  ;;  %v4598_v32 = vand.u32 4294901760, %v3261_v23  ;;  %v4603_v23 = vld [vmem:[#allocation51_spill] sm:$0xff]  ;;  %v4651_v18 = vld [vmem:[#allocation62_spill] sm:$0xff]  ;;  %v4652_v61 = vld [vmem:[#allocation65_spill] sm:$0xff] }
 0x11d   :  { %2623 = vmatprep.subr.bf16.mxu0 %v2622_v13  ;;  %v2626_v59 = vpack.c.bf16 %v4572_v8, %v4570_v5  ;;  %2661 = vmatpush3.bf16.msra.mxu1 %v4573_v7  ;;  %v4583_v13 = vld [vmem:[#allocation45_spill] sm:$0xff]  ;;  %v4622_v58 = vand.u32 4294901760, %v3768_v62 }
 0x11e   :  { %1073 = vmatmul.mubr.f32.gmra.mrb[36].mxu0 %v4555_v19  ;;  %1342 = vmatmul.mubr.f32.gmra.mrb[40].mxu1 %v4575_v11  ;;  %v4582_v19 = vand.u32 4294901760, %v3174_v17  ;;  %v4588_v17 = vld [vmem:[#allocation46_spill] sm:$0xff]  ;;  %v4611_v11 = vld [vmem:[#allocation49_spill] sm:$0xff] }
 0x11f   :  { %1079 = vmatprep.mubr.f32.mxu0 %v3459_v14  ;;  %1349 = vmatprep.mubr.f32.mxu1 %v4577_v60  ;;  %v4584_v14 = vand.u32 4294901760, %v3561_v28 }
 0x120   :  { %2625 = vmatpush3.bf16.msra.mxu0 %v2624_v50  ;;  %2663 = vmatprep.subr.bf16.mxu1 %v4580_v43  ;;  %v2630_v41 = vpack.c.bf16 %v4582_v19, %v4581_v31  ;;  %v4597_v50 = vand.u32 4294901760, %v3256_v22  ;;  %v4602_v22 = vand.u32 4294901760, %v3267_v63  ;;  %v4609_v63 = vand.u32 4294901760, %v4608_v26 }
 0x121   :  { %2627 = vmatprep.subr.bf16.mxu0 %v2626_v59  ;;  %2665 = vmatpush3.bf16.msra.mxu1 %v4583_v13  ;;  %v4624_v43 = vand.u32 4294901760, %v3785_v24  ;;  %v4625_v31 = vand.u32 4294901760, %v3794_v44  ;;  %v4627_v19 = vand.u32 4294901760, %v3812_v6  ;;  %v4638_v13 = vld [vmem:[#allocation26_spill] sm:$0xff] }
 0x122   :  { %1082 = vmatmul.mubr.f32.gmra.mrb[38].mxu0 %v4564_v40  ;;  %1353 = vmatmul.mubr.f32.gmra.mrb[42].mxu1 %v4584_v14  ;;  %v4590_v40 = vand.u32 4294901760, %v3201_v45  ;;  %v4596_v45 = vld [vmem:[#allocation50_spill] sm:$0xff]  ;;  %v2638_v5 = vpack.c.bf16 %v4598_v32, %v4597_v50  ;;  %v2640_v8 = vpack.c.bf16 %v4602_v22, %v4601_v36  ;;  %v4639_v14 = vld [vmem:[#allocation52_spill] sm:$0xff] }
 0x123   :  { %1088 = vmatprep.mubr.f32.mxu0 %v3512_v0  ;;  %1360 = vmatprep.mubr.f32.mxu1 %v4585_v34  ;;  %v4592_v0 = vand.u32 4294901760, %v3595_v51  ;;  %v4640_v34 = vld [vmem:[#allocation28_spill] sm:$0xff]  ;;  %v4656_v32 = vld [vmem:[#allocation14_spill] sm:$0xff] }
 0x124   :  { %2629 = vmatpush3.bf16.msra.mxu0 %v2628_v42  ;;  %2667 = vmatprep.subr.bf16.mxu1 %v4588_v17  ;;  %v2634_v10 = vpack.c.bf16 %v4590_v40, %v4589_v1  ;;  %v4623_v42 = vand.u32 4294901760, %v3774_v35  ;;  %v4644_v17 = vld [vmem:[#allocation32_spill] sm:$0xff]  ;;  %v4645_v1 = vld [vmem:[#allocation33_spill] sm:$0xff]  ;;  %v4646_v40 = vld [vmem:[#allocation55_spill] sm:$0xff] }
 0x125   :  { %2631 = vmatprep.subr.bf16.mxu0 %v2630_v41  ;;  %2669 = vmatpush3.bf16.msra.mxu1 %v4591_v47  ;;  %v4631_v41 = vld [vmem:[#allocation18_spill] sm:$0xff]  ;;  %v4648_v47 = vld [vmem:[#allocation57_spill] sm:$0xff]  ;;  %v4655_v50 = vld [vmem:[#allocation48_spill] sm:$0xff] }
 0x126   :  { %1091 = vmatmul.mubr.f32.gmra.mrb[40].mxu0 %v4574_v15  ;;  %1364 = vmatmul.mubr.f32.gmra.mrb[44].mxu1 %v4592_v0  ;;  %v4610_v15 = vand.u32 4294901760, %v4524_v39  ;;  %v4618_v39 = vld [vmem:[#allocation67_spill] sm:$0xff]  ;;  %v4649_v0 = vld [vmem:[#allocation58_spill] sm:$0xff] }
 0x127   :  { %1097 = vmatprep.mubr.f32.mxu0 %v4576_v57  ;;  %1371 = vmatprep.mubr.f32.mxu1 %v4593_v37  ;;  %v4619_v29 = vand.u32 4294901760, %v4618_v39  ;;  %v4650_v37 = vld [vmem:[#allocation60_spill] sm:$0xff] }
 0x128   :  { %2633 = vmatpush3.bf16.msra.mxu0 %v2632_v9  ;;  %2671 = vmatprep.subr.bf16.mxu1 %v4596_v45  ;;  %v4643_v9 = vld [vmem:[#allocation31_spill] sm:$0xff]  ;;  %v4654_v45 = vld [vmem:[#allocation68_spill] sm:$0xff] }
 0x129   :  { %2635 = vmatprep.subr.bf16.mxu0 %v2634_v10  ;;  %2673 = vmatpush3.bf16.msra.mxu1 %v3310_v33  ;;  %v4604_v33 = vand.u32 4294901760, %v3274_v53  ;;  %v4613_v53 = vld [vmem:[#allocation63_spill] sm:$0xff]  ;;  %v4647_v10 = vld [vmem:[#allocation56_spill] sm:$0xff] }
 0x12a   :  { %1100 = vmatmul.mubr.f32.gmra.mrb[42].mxu0 %v3561_v28  ;;  %1375 = vmatmul.mubr.f32.gmra.mrb[46].mxu1 %v4599_v2  ;;  %v4605_v28 = vand.u32 4294901760, %v3280_v27  ;;  %v4614_v27 = vand.u32 4294901760, %v4613_v53  ;;  %v4658_v2 = vld [vmem:[#allocation70_spill] sm:$0xff] }
 0x12b   :  { %1106 = vmatprep.mubr.f32.mxu0 %v3586_v16  ;;  %1382 = vmatprep.mubr.f32.mxu1 %v4600_v20  ;;  %v4606_v16 = vld [vmem:[#allocation59_spill] sm:$0xff] }
 0x12c   :  { %2637 = vmatpush3.bf16.msra.mxu0 %v2636_v52  ;;  %2675 = vmatprep.subr.bf16.mxu1 %v4603_v23  ;;  %v2642_v59 = vpack.c.bf16 %v4605_v28, %v4604_v33  ;;  %v4607_v7 = vand.u32 4294901760, %v4606_v16  ;;  %v4653_v52 = vld [vmem:[#allocation66_spill] sm:$0xff] }
 0x12d   :  { %2639 = vmatprep.subr.bf16.mxu0 %v2638_v5  ;;  %2677 = vmatpush3.bf16.msra.mxu1 %v3319_v12  ;;  %v4612_v12 = vand.u32 4294901760, %v4611_v11  ;;  %v4657_v5 = vld [vmem:[#allocation69_spill] sm:$0xff] }
 0x12e   :  { %1109 = vmatmul.mubr.f32.gmra.mrb[44].mxu0 %v3595_v51  ;;  %1386 = vmatmul.mubr.f32.gmra.mrb[48].mxu1 %v4607_v7  ;;  %v4615_v51 = vld [vmem:[#allocation64_spill] sm:$0xff] }
 0x12f   :  { %1115 = vmatprep.mubr.f32.mxu0 %v3609_v49  ;;  %1393 = vmatprep.mubr.f32.mxu1 %v4609_v63  ;;  %v2644_v57 = vpack.c.bf16 %v4612_v12, %v4610_v15  ;;  %v4616_v60 = vand.u32 4294901760, %v4615_v51  ;;  %v4617_v49 = vand.u32 4294901760, %v3712_v38 }
 0x130   :  { %2641 = vmatpush3.bf16.msra.mxu0 %v2640_v8 }
 0x131   :  { %2643 = vmatprep.subr.bf16.mxu0 %v2642_v59 }
 0x132   :  { %1118 = vmatmul.mubr.f32.gmra.mrb[46].mxu0 %v3632_v48  ;;  %1397 = vmatmul.mubr.f32.gmra.mrb[50].mxu1 %v4614_v27  ;;  %v4620_v48 = vand.u32 4294901760, %v3741_v3 }
 0x133   :  { %1124 = vmatprep.mubr.f32.mxu0 %v3656_v55  ;;  %1404 = vmatprep.mubr.f32.mxu1 %v4616_v60  ;;  %v4621_v55 = vand.u32 4294901760, %v3752_v4 }
 0x134   :  { %2645 = vmatpush3.bf16.msra.mxu0 %v2644_v57 }
 0x136   :  { %1127 = vmatmul.mubr.f32.gmra.mrb[48].mxu0 %v4606_v16  ;;  %1408 = vmatmul.mubr.f32.gmra.mrb[52].mxu1 %v4617_v49 }
 0x137   :  { %1133 = vmatprep.mubr.f32.mxu0 %v4608_v26  ;;  %1415 = vmatprep.mubr.f32.mxu1 %v4619_v29 }
 0x13a   :  { %1136 = vmatmul.mubr.f32.gmra.mrb[50].mxu0 %v4613_v53  ;;  %1419 = vmatmul.mubr.f32.gmra.mrb[54].mxu1 %v4620_v48 }
 0x13b   :  { %1142 = vmatprep.mubr.f32.mxu0 %v4615_v51  ;;  %1426 = vmatprep.mubr.f32.mxu1 %v4621_v55 }
 0x13e   :  { %1145 = vmatmul.mubr.f32.gmra.mrb[52].mxu0 %v3712_v38  ;;  %1430 = vmatmul.mubr.f32.gmra.mrb[56].mxu1 %v4622_v58  ;;  %v4626_v38 = vand.u32 4294901760, %v3805_v30 }
 0x13f   :  { %1151 = vmatprep.mubr.f32.mxu0 %v4618_v39  ;;  %1437 = vmatprep.mubr.f32.mxu1 %v4623_v42 }
 0x142   :  { %1154 = vmatmul.mubr.f32.gmra.mrb[54].mxu0 %v3741_v3  ;;  %1441 = vmatmul.mubr.f32.gmra.mrb[58].mxu1 %v4624_v43  ;;  %v4628_v3 = vand.u32 4294901760, %v3821_v25 }
 0x143   :  { %1160 = vmatprep.mubr.f32.mxu0 %v3752_v4  ;;  %1448 = vmatprep.mubr.f32.mxu1 %v4625_v31  ;;  %v4629_v4 = vld [vmem:[#allocation12_spill] sm:$0xff] }
 0x146   :  { %1163 = vmatmul.mubr.f32.gmra.mrb[56].mxu0 %v3768_v62  ;;  %1452 = vmatmul.mubr.f32.gmra.mrb[60].mxu1 %v4626_v38  ;;  %v4630_v62 = vld [vmem:[#allocation11_spill] sm:$0xff] }
 0x147   :  { %1169 = vmatprep.mubr.f32.mxu0 %v3774_v35  ;;  %1459 = vmatprep.mubr.f32.mxu1 %v4627_v19  ;;  %v4632_v35 = vld [vmem:[#allocation16_spill] sm:$0xff] }
 0x14a   :  { %1172 = vmatmul.mubr.f32.gmra.mrb[58].mxu0 %v3785_v24  ;;  %1463 = vmatmul.mubr.f32.gmra.mrb[62].mxu1 %v4628_v3  ;;  %v4633_v24 = vld [vmem:[#allocation17_spill] sm:$0xff] }
 0x14b   :  { %1178 = vmatprep.mubr.f32.mxu0 %v3794_v44  ;;  %1838 = vmatprep.mubr.f32.mxu1 %v4629_v4  ;;  %v4634_v44 = vld [vmem:[#allocation19_spill] sm:$0xff] }
 0x14e   :  { %1181 = vmatmul.mubr.f32.gmra.mrb[60].mxu0 %v3805_v30  ;;  %1840 = vmatmul.mubr.f32.vlgmr.msra.gmra.mrb[64].mxu1 %v4630_v62  ;;  %v4635_v30 = vld [vmem:[#allocation22_spill] sm:$0xff] }
 0x14f   :  { %1187 = vmatprep.mubr.f32.mxu0 %v3812_v6  ;;  %1845 = vmatprep.mubr.f32.mxu1 %v4631_v41  ;;  %v4636_v6 = vld [vmem:[#allocation23_spill] sm:$0xff] }
 0x152   :  { %1190 = vmatmul.mubr.f32.gmra.mrb[62].mxu0 %v3821_v25  ;;  %1847 = vmatmul.mubr.f32.gmra.mrb[66].mxu1 %v4632_v35  ;;  %v4637_v25 = vld [vmem:[#allocation25_spill] sm:$0xff] }
 0x153   :  { %1629 = vmatprep.mubr.f32.mxu0 %v4629_v4  ;;  %1852 = vmatprep.mubr.f32.mxu1 %v4633_v24 }
 0x156   :  { %1631 = vmatmul.mubr.f32.vlgmr.msra.gmra.mrb[64].mxu0 %v4630_v62  ;;  %1854 = vmatmul.mubr.f32.gmra.mrb[68].mxu1 %v4634_v44 }
 0x157   :  { %1636 = vmatprep.mubr.f32.mxu0 %v4631_v41  ;;  %1859 = vmatprep.mubr.f32.mxu1 %v4635_v30 }
 0x15a   :  { %1638 = vmatmul.mubr.f32.gmra.mrb[66].mxu0 %v4632_v35  ;;  %1861 = vmatmul.mubr.f32.gmra.mrb[70].mxu1 %v4636_v6 }
 0x15b   :  { %1643 = vmatprep.mubr.f32.mxu0 %v4633_v24  ;;  %1866 = vmatprep.mubr.f32.mxu1 %v4637_v25 }
 0x15e   :  { %1645 = vmatmul.mubr.f32.gmra.mrb[68].mxu0 %v4634_v44  ;;  %1868 = vmatmul.mubr.f32.gmra.mrb[72].mxu1 %v4638_v13 }
 0x15f   :  { %1650 = vmatprep.mubr.f32.mxu0 %v4635_v30  ;;  %1873 = vmatprep.mubr.f32.mxu1 %v4639_v14 }
 0x162   :  { %1652 = vmatmul.mubr.f32.gmra.mrb[70].mxu0 %v4636_v6  ;;  %1875 = vmatmul.mubr.f32.gmra.mrb[74].mxu1 %v4640_v34 }
 0x163   :  { %1657 = vmatprep.mubr.f32.mxu0 %v4637_v25  ;;  %1880 = vmatprep.mubr.f32.mxu1 %v4641_v54 }
 0x166   :  { %1659 = vmatmul.mubr.f32.gmra.mrb[72].mxu0 %v4638_v13  ;;  %1882 = vmatmul.mubr.f32.gmra.mrb[76].mxu1 %v4642_v56 }
 0x167   :  { %1664 = vmatprep.mubr.f32.mxu0 %v4639_v14  ;;  %1887 = vmatprep.mubr.f32.mxu1 %v4643_v9 }
 0x16a   :  { %1666 = vmatmul.mubr.f32.gmra.mrb[74].mxu0 %v4640_v34  ;;  %1889 = vmatmul.mubr.f32.gmra.mrb[78].mxu1 %v4644_v17 }
 0x16b   :  { %1671 = vmatprep.mubr.f32.mxu0 %v4641_v54  ;;  %1894 = vmatprep.mubr.f32.mxu1 %v4645_v1 }
 0x16e   :  { %1673 = vmatmul.mubr.f32.gmra.mrb[76].mxu0 %v4642_v56  ;;  %1896 = vmatmul.mubr.f32.gmra.mrb[80].mxu1 %v4646_v40 }
 0x16f   :  { %1678 = vmatprep.mubr.f32.mxu0 %v4643_v9  ;;  %1901 = vmatprep.mubr.f32.mxu1 %v4647_v10 }
 0x172   :  { %1680 = vmatmul.mubr.f32.gmra.mrb[78].mxu0 %v4644_v17  ;;  %1903 = vmatmul.mubr.f32.gmra.mrb[82].mxu1 %v4648_v47 }
 0x173   :  { %1685 = vmatprep.mubr.f32.mxu0 %v4645_v1  ;;  %1908 = vmatprep.mubr.f32.mxu1 %v4649_v0 }
 0x176   :  { %1687 = vmatmul.mubr.f32.gmra.mrb[80].mxu0 %v4646_v40  ;;  %1910 = vmatmul.mubr.f32.gmra.mrb[84].mxu1 %v4650_v37 }
 0x177   :  { %1692 = vmatprep.mubr.f32.mxu0 %v4647_v10  ;;  %1915 = vmatprep.mubr.f32.mxu1 %v4651_v18 }
 0x17a   :  { %1694 = vmatmul.mubr.f32.gmra.mrb[82].mxu0 %v4648_v47  ;;  %1917 = vmatmul.mubr.f32.gmra.mrb[86].mxu1 %v4652_v61 }
 0x17b   :  { %1699 = vmatprep.mubr.f32.mxu0 %v4649_v0  ;;  %1922 = vmatprep.mubr.f32.mxu1 %v4653_v52 }
 0x17e   :  { %1701 = vmatmul.mubr.f32.gmra.mrb[84].mxu0 %v4650_v37  ;;  %1924 = vmatmul.mubr.f32.gmra.mrb[88].mxu1 %v4654_v45 }
 0x17f   :  { %1706 = vmatprep.mubr.f32.mxu0 %v4651_v18  ;;  %1929 = vmatprep.mubr.f32.mxu1 %v4655_v50 }
 0x182   :  { %1708 = vmatmul.mubr.f32.gmra.mrb[86].mxu0 %v4652_v61  ;;  %1931 = vmatmul.mubr.f32.gmra.mrb[90].mxu1 %v3764_v21 }
 0x183   :  { %1713 = vmatprep.mubr.f32.mxu0 %v4653_v52  ;;  %1936 = vmatprep.mubr.f32.mxu1 %v3771_v46 }
 0x186   :  { %1715 = vmatmul.mubr.f32.gmra.mrb[88].mxu0 %v4654_v45  ;;  %1938 = vmatmul.mubr.f32.gmra.mrb[92].mxu1 %v4656_v32 }
 0x187   :  { %1720 = vmatprep.mubr.f32.mxu0 %v4655_v50  ;;  %1943 = vmatprep.mubr.f32.mxu1 %v4657_v5 }
 0x18a   :  { %1722 = vmatmul.mubr.f32.gmra.mrb[90].mxu0 %v3764_v21  ;;  %1945 = vmatmul.mubr.f32.gmra.mrb[94].mxu1 %v4658_v2 }
 0x18b   :  { %1727 = vmatprep.mubr.f32.mxu0 %v3771_v46 }
 0x18e   :  { %1729 = vmatmul.mubr.f32.gmra.mrb[92].mxu0 %v4656_v32 }
 0x18f   :  { %1734 = vmatprep.mubr.f32.mxu0 %v4657_v5 }
 0x192   :  { %1736 = vmatmul.mubr.f32.gmra.mrb[94].mxu0 %v4658_v2 }
 0x19e   :  { %v2118_v20 = vpop.f32.mrb[0].mxu1 }
 0x19f   :  { %v2119_v36 = vpop.f32.mrb[1].mxu1 }
 0x1a0   :  { %v2120_v22 = vadd.f32 %v2119_v36, %v2118_v20 }
 0x1a2   :  { %v2121_v8 = vpop.f32.mrb[2].mxu1 }
 0x1a3   :  { %v2122_v23 = vpop.f32.mrb[3].mxu1 }
 0x1a4   :  { %v2123_v33 = vadd.f32 %v2122_v23, %v2121_v8 }
 0x1a6   :  { %v2038_v28 = vpop.f32.mrb[0].mxu0  ;;  %v2124_v59 = vpop.f32.mrb[4].mxu1 }
 0x1a7   :  { %v2039_v16 = vpop.f32.mrb[1].mxu0  ;;  %v2125_v21 = vpop.f32.mrb[5].mxu1 }
 0x1a8   :  { %v2040_v7 = vadd.f32 %v2039_v16, %v2038_v28  ;;  %v2126_v26 = vadd.f32 %v2125_v21, %v2124_v59 }
 0x1aa   :  { %v4075_v63 = vadd.f32 %v2120_v22, %v2040_v7 }
 0x1ab   :  { %v2041_v46 = vpop.f32.mrb[2].mxu0 }
 0x1ac   :  { %v2127_v15 = vpop.f32.mrb[6].mxu1  ;;  %v2042_v11 = vpop.f32.mrb[3].mxu0 }
 0x1ad   :  { %v2128_v12 = vpop.f32.mrb[7].mxu1  ;;  %v2043_v57 = vadd.f32 %v2042_v11, %v2041_v46 }
 0x1ae   :  { %v2129_v53 = vadd.f32 %v2128_v12, %v2127_v15 }
 0x1af   :  { %v4077_v27 = vadd.f32 %v2123_v33, %v2043_v57  ;;  %v2044_v51 = vpop.f32.mrb[4].mxu0 }
 0x1b0   :  { %v2130_v60 = vpop.f32.mrb[8].mxu1  ;;  %v2045_v49 = vpop.f32.mrb[5].mxu0 }
 0x1b1   :  { %v2131_v39 = vpop.f32.mrb[9].mxu1  ;;  %v2046_v29 = vadd.f32 %v2045_v49, %v2044_v51 }
 0x1b2   :  { %v2132_v48 = vadd.f32 %v2131_v39, %v2130_v60 }
 0x1b3   :  { %v4079_v55 = vadd.f32 %v2126_v26, %v2046_v29  ;;  %v2047_v58 = vpop.f32.mrb[6].mxu0 }
 0x1b4   :  { %v2133_v42 = vpop.f32.mrb[10].mxu1  ;;  %v2048_v43 = vpop.f32.mrb[7].mxu0 }
 0x1b5   :  { %v2134_v31 = vpop.f32.mrb[11].mxu1  ;;  %v2049_v38 = vadd.f32 %v2048_v43, %v2047_v58 }
 0x1b6   :  { %v2135_v19 = vadd.f32 %v2134_v31, %v2133_v42 }
 0x1b7   :  { %v4081_v3 = vadd.f32 %v2129_v53, %v2049_v38  ;;  %v2050_v4 = vpop.f32.mrb[8].mxu0 }
 0x1b8   :  { %v2136_v62 = vpop.f32.mrb[12].mxu1  ;;  %v2051_v41 = vpop.f32.mrb[9].mxu0 }
 0x1b9   :  { %v2137_v35 = vpop.f32.mrb[13].mxu1  ;;  %v2052_v24 = vadd.f32 %v2051_v41, %v2050_v4 }
 0x1ba   :  { %v2138_v44 = vadd.f32 %v2137_v35, %v2136_v62 }
 0x1bb   :  { %v4083_v30 = vadd.f32 %v2132_v48, %v2052_v24  ;;  %v2053_v6 = vpop.f32.mrb[10].mxu0 }
 0x1bc   :  { %v2139_v25 = vpop.f32.mrb[14].mxu1  ;;  %v2054_v13 = vpop.f32.mrb[11].mxu0 }
 0x1bd   :  { %v2140_v14 = vpop.f32.mrb[15].mxu1  ;;  %v2055_v34 = vadd.f32 %v2054_v13, %v2053_v6 }
 0x1be   :  { %v2141_v54 = vadd.f32 %v2140_v14, %v2139_v25 }
 0x1bf   :  { %v4085_v56 = vadd.f32 %v2135_v19, %v2055_v34 }
 0x1c1   :  { %v2056_v9 = vpop.f32.mrb[12].mxu0  ;;  %v2142_v17 = vpop.f32.mrb[16].mxu1 }
 0x1c2   :  { %v2057_v1 = vpop.f32.mrb[13].mxu0  ;;  %v2143_v40 = vpop.f32.mrb[17].mxu1 }
 0x1c3   :  { %v2058_v10 = vadd.f32 %v2057_v1, %v2056_v9  ;;  %v2144_v47 = vadd.f32 %v2143_v40, %v2142_v17 }
 0x1c5   :  { %v4087_v0 = vadd.f32 %v2138_v44, %v2058_v10  ;;  %v2059_v37 = vpop.f32.mrb[14].mxu0  ;;  %v2145_v18 = vpop.f32.mrb[18].mxu1 }
 0x1c6   :  { %v2060_v61 = vpop.f32.mrb[15].mxu0  ;;  %v2146_v52 = vpop.f32.mrb[19].mxu1 }
 0x1c7   :  { %v2061_v45 = vadd.f32 %v2060_v61, %v2059_v37  ;;  %v2147_v50 = vadd.f32 %v2146_v52, %v2145_v18 }
 0x1c9   :  { %v4089_v32 = vadd.f32 %v2141_v54, %v2061_v45  ;;  %v2062_v5 = vpop.f32.mrb[16].mxu0  ;;  %v2148_v2 = vpop.f32.mrb[20].mxu1 }
 0x1ca   :  { %v2063_v20 = vpop.f32.mrb[17].mxu0  ;;  %v2149_v36 = vpop.f32.mrb[21].mxu1 }
 0x1cb   :  { %v2064_v22 = vadd.f32 %v2063_v20, %v2062_v5  ;;  %v2150_v8 = vadd.f32 %v2149_v36, %v2148_v2 }
 0x1cd   :  { %v4091_v23 = vadd.f32 %v2144_v47, %v2064_v22  ;;  %v2065_v33 = vpop.f32.mrb[18].mxu0  ;;  %v2151_v28 = vpop.f32.mrb[22].mxu1 }
 0x1ce   :  { %v2066_v59 = vpop.f32.mrb[19].mxu0  ;;  %v2152_v16 = vpop.f32.mrb[23].mxu1 }
 0x1cf   :  { %v2067_v21 = vadd.f32 %v2066_v59, %v2065_v33  ;;  %v2153_v7 = vadd.f32 %v2152_v16, %v2151_v28 }
 0x1d1   :  { %v4093_v26 = vadd.f32 %v2147_v50, %v2067_v21  ;;  %v2068_v46 = vpop.f32.mrb[20].mxu0  ;;  %v2154_v15 = vpop.f32.mrb[24].mxu1 }
 0x1d2   :  { %v2069_v11 = vpop.f32.mrb[21].mxu0  ;;  %v2155_v12 = vpop.f32.mrb[25].mxu1 }
 0x1d3   :  { %v2070_v57 = vadd.f32 %v2069_v11, %v2068_v46  ;;  %v2156_v53 = vadd.f32 %v2155_v12, %v2154_v15 }
 0x1d5   :  { %v4095_v51 = vadd.f32 %v2150_v8, %v2070_v57  ;;  %v2071_v60 = vpop.f32.mrb[22].mxu0  ;;  %v2157_v49 = vpop.f32.mrb[26].mxu1 }
 0x1d6   :  { %v2072_v39 = vpop.f32.mrb[23].mxu0  ;;  %v2158_v29 = vpop.f32.mrb[27].mxu1 }
 0x1d7   :  { %v2073_v48 = vadd.f32 %v2072_v39, %v2071_v60  ;;  %v2159_v58 = vadd.f32 %v2158_v29, %v2157_v49 }
 0x1d9   :  { %v4097_v42 = vadd.f32 %v2153_v7, %v2073_v48  ;;  %v2074_v43 = vpop.f32.mrb[24].mxu0  ;;  %v2160_v31 = vpop.f32.mrb[28].mxu1 }
 0x1da   :  { %v2075_v38 = vpop.f32.mrb[25].mxu0  ;;  %v2161_v19 = vpop.f32.mrb[29].mxu1 }
 0x1db   :  { %v2076_v4 = vadd.f32 %v2075_v38, %v2074_v43  ;;  %v2162_v62 = vadd.f32 %v2161_v19, %v2160_v31 }
 0x1dd   :  { %v4099_v41 = vadd.f32 %v2156_v53, %v2076_v4  ;;  %v2077_v35 = vpop.f32.mrb[26].mxu0  ;;  %v2163_v24 = vpop.f32.mrb[30].mxu1 }
 0x1de   :  { %v2078_v44 = vpop.f32.mrb[27].mxu0  ;;  %v2164_v6 = vpop.f32.mrb[31].mxu1 }
 0x1df   :  { %v2079_v25 = vadd.f32 %v2078_v44, %v2077_v35  ;;  %v2165_v13 = vadd.f32 %v2164_v6, %v2163_v24 }
 0x1e1   :  { %v4101_v14 = vadd.f32 %v2159_v58, %v2079_v25  ;;  %v2080_v34 = vpop.f32.mrb[28].mxu0  ;;  %v2278_v54 = vpop.f32.mrb[32].mxu1 }
 0x1e2   :  { %v2081_v9 = vpop.f32.mrb[29].mxu0  ;;  %v2279_v17 = vpop.f32.mrb[33].mxu1 }
 0x1e3   :  { %v2082_v1 = vadd.f32 %v2081_v9, %v2080_v34  ;;  %v2280_v40 = vadd.f32 %v2279_v17, %v2278_v54 }
 0x1e5   :  { %v4103_v10 = vadd.f32 %v2162_v62, %v2082_v1  ;;  %v2083_v47 = vpop.f32.mrb[30].mxu0  ;;  %v2281_v37 = vpop.f32.mrb[34].mxu1 }
 0x1e6   :  { %v2084_v18 = vpop.f32.mrb[31].mxu0  ;;  %v2282_v61 = vpop.f32.mrb[35].mxu1 }
 0x1e7   :  { %v2085_v52 = vadd.f32 %v2084_v18, %v2083_v47  ;;  %v2283_v45 = vadd.f32 %v2282_v61, %v2281_v37 }
 0x1e9   :  { %v4105_v50 = vadd.f32 %v2165_v13, %v2085_v52  ;;  %v2198_v5 = vpop.f32.mrb[32].mxu0  ;;  %v2284_v2 = vpop.f32.mrb[36].mxu1 }
 0x1ea   :  { %v2199_v20 = vpop.f32.mrb[33].mxu0  ;;  %v2285_v36 = vpop.f32.mrb[37].mxu1 }
 0x1eb   :  { %v2200_v22 = vadd.f32 %v2199_v20, %v2198_v5  ;;  %v2286_v8 = vadd.f32 %v2285_v36, %v2284_v2 }
 0x1ed   :  { %v1057_v33 = vadd.f32 %v2200_v22, %v4075_v63  ;;  %v2201_v28 = vpop.f32.mrb[34].mxu0  ;;  %v2287_v59 = vpop.f32.mrb[38].mxu1 }
 0x1ee   :  { %v2202_v16 = vpop.f32.mrb[35].mxu0  ;;  %v2288_v21 = vpop.f32.mrb[39].mxu1 }
 0x1ef   :  { %v2203_v7 = vadd.f32 %v2202_v16, %v2201_v28  ;;  %v2289_v46 = vadd.f32 %v2288_v21, %v2287_v59  ;;  %v4108_v15 = vadd.f32 %v2280_v40, %v1057_v33 }
 0x1f1   :  { %v1066_v11 = vadd.f32 %v2203_v7, %v4077_v27  ;;  %v2204_v12 = vpop.f32.mrb[36].mxu0  ;;  %v2290_v57 = vpop.f32.mrb[40].mxu1 }
 0x1f2   :  { %v2205_v53 = vpop.f32.mrb[37].mxu0  ;;  %v2291_v60 = vpop.f32.mrb[41].mxu1 }
 0x1f3   :  { %v2206_v49 = vadd.f32 %v2205_v53, %v2204_v12  ;;  %v2292_v39 = vadd.f32 %v2291_v60, %v2290_v57  ;;  %v4111_v29 = vadd.f32 %v2283_v45, %v1066_v11 }
 0x1f5   :  { %v1075_v63 = vadd.f32 %v2206_v49, %v4079_v55  ;;  %v2207_v48 = vpop.f32.mrb[38].mxu0  ;;  %v2293_v58 = vpop.f32.mrb[42].mxu1 }
 0x1f6   :  { %v2208_v43 = vpop.f32.mrb[39].mxu0  ;;  %v2294_v31 = vpop.f32.mrb[43].mxu1 }
 0x1f7   :  { %v2209_v38 = vadd.f32 %v2208_v43, %v2207_v48  ;;  %v2295_v19 = vadd.f32 %v2294_v31, %v2293_v58  ;;  %v4114_v4 = vadd.f32 %v2286_v8, %v1075_v63 }
 0x1f9   :  { %v1084_v27 = vadd.f32 %v2209_v38, %v4081_v3  ;;  %v2210_v62 = vpop.f32.mrb[40].mxu0  ;;  %v2296_v35 = vpop.f32.mrb[44].mxu1 }
 0x1fa   :  { %v2211_v24 = vpop.f32.mrb[41].mxu0  ;;  %v2297_v44 = vpop.f32.mrb[45].mxu1 }
 0x1fb   :  { %v2212_v6 = vadd.f32 %v2211_v24, %v2210_v62  ;;  %v2298_v25 = vadd.f32 %v2297_v44, %v2296_v35  ;;  %v4117_v13 = vadd.f32 %v2289_v46, %v1084_v27 }
 0x1fd   :  { %v1093_v55 = vadd.f32 %v2212_v6, %v4083_v30  ;;  %v2213_v34 = vpop.f32.mrb[42].mxu0  ;;  %v2299_v54 = vpop.f32.mrb[46].mxu1 }
 0x1fe   :  { %v2214_v9 = vpop.f32.mrb[43].mxu0  ;;  %v2300_v17 = vpop.f32.mrb[47].mxu1 }
 0x1ff   :  { %v2215_v1 = vadd.f32 %v2214_v9, %v2213_v34  ;;  %v2301_v40 = vadd.f32 %v2300_v17, %v2299_v54  ;;  %v4120_v47 = vadd.f32 %v2292_v39, %v1093_v55 }
 0x201   :  { %v1102_v3 = vadd.f32 %v2215_v1, %v4085_v56  ;;  %v2216_v37 = vpop.f32.mrb[44].mxu0  ;;  %v2302_v18 = vpop.f32.mrb[48].mxu1 }
 0x202   :  { %v2217_v61 = vpop.f32.mrb[45].mxu0  ;;  %v2303_v52 = vpop.f32.mrb[49].mxu1 }
 0x203   :  { %v2218_v45 = vadd.f32 %v2217_v61, %v2216_v37  ;;  %v2304_v5 = vadd.f32 %v2303_v52, %v2302_v18  ;;  %v4123_v2 = vadd.f32 %v2295_v19, %v1102_v3 }
 0x205   :  { %v1111_v30 = vadd.f32 %v2218_v45, %v4087_v0  ;;  %v2219_v20 = vpop.f32.mrb[46].mxu0  ;;  %v2305_v36 = vpop.f32.mrb[50].mxu1 }
 0x206   :  { %v2220_v22 = vpop.f32.mrb[47].mxu0  ;;  %v2306_v8 = vpop.f32.mrb[51].mxu1 }
 0x207   :  { %v2221_v33 = vadd.f32 %v2220_v22, %v2219_v20  ;;  %v2307_v28 = vadd.f32 %v2306_v8, %v2305_v36  ;;  %v4126_v59 = vadd.f32 %v2298_v25, %v1111_v30 }
 0x209   :  { %v1120_v56 = vadd.f32 %v2221_v33, %v4089_v32  ;;  %v2222_v16 = vpop.f32.mrb[48].mxu0  ;;  %v2308_v21 = vpop.f32.mrb[52].mxu1 }
 0x20a   :  { %v2223_v7 = vpop.f32.mrb[49].mxu0  ;;  %v2309_v46 = vpop.f32.mrb[53].mxu1 }
 0x20b   :  { %v2224_v11 = vadd.f32 %v2223_v7, %v2222_v16  ;;  %v2310_v12 = vadd.f32 %v2309_v46, %v2308_v21  ;;  %v4129_v57 = vadd.f32 %v2301_v40, %v1120_v56 }
 0x20d   :  { %v1129_v0 = vadd.f32 %v2224_v11, %v4091_v23  ;;  %v2225_v53 = vpop.f32.mrb[50].mxu0  ;;  %v2311_v60 = vpop.f32.mrb[54].mxu1 }
 0x20e   :  { %v2226_v49 = vpop.f32.mrb[51].mxu0  ;;  %v2312_v39 = vpop.f32.mrb[55].mxu1 }
 0x20f   :  { %v2227_v63 = vadd.f32 %v2226_v49, %v2225_v53  ;;  %v2313_v48 = vadd.f32 %v2312_v39, %v2311_v60  ;;  %v4132_v58 = vadd.f32 %v2304_v5, %v1129_v0 }
 0x211   :  { %v1138_v32 = vadd.f32 %v2227_v63, %v4093_v26  ;;  %v2228_v43 = vpop.f32.mrb[52].mxu0  ;;  %v2314_v31 = vpop.f32.mrb[56].mxu1 }
 0x212   :  { %v2229_v38 = vpop.f32.mrb[53].mxu0  ;;  %v2315_v19 = vpop.f32.mrb[57].mxu1 }
 0x213   :  { %v2230_v27 = vadd.f32 %v2229_v38, %v2228_v43  ;;  %v2316_v62 = vadd.f32 %v2315_v19, %v2314_v31  ;;  %v4135_v35 = vadd.f32 %v2307_v28, %v1138_v32 }
 0x215   :  { %v1147_v23 = vadd.f32 %v2230_v27, %v4095_v51  ;;  %v2231_v24 = vpop.f32.mrb[54].mxu0  ;;  %v2317_v44 = vpop.f32.mrb[58].mxu1 }
 0x216   :  { %v2232_v6 = vpop.f32.mrb[55].mxu0  ;;  %v2318_v25 = vpop.f32.mrb[59].mxu1 }
 0x217   :  { %v2233_v55 = vadd.f32 %v2232_v6, %v2231_v24  ;;  %v2319_v34 = vadd.f32 %v2318_v25, %v2317_v44  ;;  %v4138_v54 = vadd.f32 %v2310_v12, %v1147_v23 }
 0x219   :  { %v1156_v26 = vadd.f32 %v2233_v55, %v4097_v42  ;;  %v2234_v9 = vpop.f32.mrb[56].mxu0  ;;  %v2320_v17 = vpop.f32.mrb[60].mxu1 }
 0x21a   :  { %v2235_v1 = vpop.f32.mrb[57].mxu0  ;;  %v2321_v40 = vpop.f32.mrb[61].mxu1 }
 0x21b   :  { %v2236_v3 = vadd.f32 %v2235_v1, %v2234_v9  ;;  %v2322_v37 = vadd.f32 %v2321_v40, %v2320_v17  ;;  %v4141_v18 = vadd.f32 %v2313_v48, %v1156_v26 }
 0x21d   :  { %v1165_v51 = vadd.f32 %v2236_v3, %v4099_v41  ;;  %v2237_v61 = vpop.f32.mrb[58].mxu0  ;;  %v2323_v52 = vpop.f32.mrb[62].mxu1 }
 0x21e   :  { %v2238_v45 = vpop.f32.mrb[59].mxu0  ;;  %v2324_v5 = vpop.f32.mrb[63].mxu1 }
 0x21f   :  { %v2239_v30 = vadd.f32 %v2238_v45, %v2237_v61  ;;  %v2325_v20 = vadd.f32 %v2324_v5, %v2323_v52  ;;  %v4144_v36 = vadd.f32 %v2316_v62, %v1165_v51 }
 0x221   :  { %v1174_v42 = vadd.f32 %v2239_v30, %v4101_v14  ;;  %v2240_v22 = vpop.f32.mrb[60].mxu0  ;;  %v2438_v8 = vpop.f32.mrb[64].mxu1 }
 0x222   :  { %v2241_v33 = vpop.f32.mrb[61].mxu0  ;;  %v2439_v28 = vpop.f32.mrb[65].mxu1 }
 0x223   :  { %v2242_v56 = vadd.f32 %v2241_v33, %v2240_v22  ;;  %v2440_v16 = vadd.f32 %v2439_v28, %v2438_v8  ;;  %v4147_v21 = vadd.f32 %v2319_v34, %v1174_v42 }
 0x225   :  { %v1183_v41 = vadd.f32 %v2242_v56, %v4103_v10  ;;  %v2243_v7 = vpop.f32.mrb[62].mxu0  ;;  %v2441_v46 = vpop.f32.mrb[66].mxu1 }
 0x226   :  { %v2244_v11 = vpop.f32.mrb[63].mxu0  ;;  %v2442_v12 = vpop.f32.mrb[67].mxu1 }
 0x227   :  { %v2245_v0 = vadd.f32 %v2244_v11, %v2243_v7  ;;  %v2443_v53 = vadd.f32 %v2442_v12, %v2441_v46  ;;  %v4150_v60 = vadd.f32 %v2322_v37, %v1183_v41 }
 0x229   :  { %v1192_v14 = vadd.f32 %v2245_v0, %v4105_v50  ;;  %v2358_v49 = vpop.f32.mrb[64].mxu0  ;;  %v2444_v39 = vpop.f32.mrb[68].mxu1 }
 0x22a   :  { %v2359_v63 = vpop.f32.mrb[65].mxu0  ;;  %v2445_v48 = vpop.f32.mrb[69].mxu1 }
 0x22b   :  { %v2360_v32 = vadd.f32 %v2359_v63, %v2358_v49  ;;  %v2446_v43 = vadd.f32 %v2445_v48, %v2444_v39  ;;  %v4153_v31 = vadd.f32 %v2325_v20, %v1192_v14 }
 0x22d   :  { %v1633_v10 = vadd.f32 %v2360_v32, %v4108_v15  ;;  %v2361_v38 = vpop.f32.mrb[66].mxu0  ;;  %v2447_v19 = vpop.f32.mrb[70].mxu1 }
 0x22e   :  { %v2362_v27 = vpop.f32.mrb[67].mxu0  ;;  %v2448_v62 = vpop.f32.mrb[71].mxu1 }
 0x22f   :  { %v2363_v23 = vadd.f32 %v2362_v27, %v2361_v38  ;;  %v2449_v24 = vadd.f32 %v2448_v62, %v2447_v19  ;;  %v1842_v44 = vadd.f32 %v2440_v16, %v1633_v10 }
 0x231   :  { %v1640_v6 = vadd.f32 %v2363_v23, %v4111_v29  ;;  %v2364_v50 = vpop.f32.mrb[68].mxu0  ;;  %v2450_v25 = vpop.f32.mrb[72].mxu1  ;;  %1950 = vxpose.xlu0.b32.start [1/16] (narrow) %v1842_v44, 8 }
 0x232   :  { %v2365_v55 = vpop.f32.mrb[69].mxu0  ;;  %v2451_v34 = vpop.f32.mrb[73].mxu1 }
 0x233   :  { %v2366_v26 = vadd.f32 %v2365_v55, %v2364_v50  ;;  %v2452_v9 = vadd.f32 %v2451_v34, %v2450_v25  ;;  %v1849_v17 = vadd.f32 %v2443_v53, %v1640_v6 }
 0x235   :  { %v1647_v1 = vadd.f32 %v2366_v26, %v4114_v4  ;;  %v2367_v15 = vpop.f32.mrb[70].mxu0  ;;  %v2453_v40 = vpop.f32.mrb[74].mxu1  ;;  %1951 = vxpose.xlu0.b32.cont [2/16] (narrow) %v1849_v17, 8 }
 0x236   :  { %v2368_v3 = vpop.f32.mrb[71].mxu0  ;;  %v2454_v37 = vpop.f32.mrb[75].mxu1 }
 0x237   :  { %v2369_v51 = vadd.f32 %v2368_v3, %v2367_v15  ;;  %v2455_v61 = vadd.f32 %v2454_v37, %v2453_v40  ;;  %v1856_v52 = vadd.f32 %v2446_v43, %v1647_v1 }
 0x239   :  { %v1654_v29 = vadd.f32 %v2369_v51, %v4117_v13  ;;  %v2370_v45 = vpop.f32.mrb[72].mxu0  ;;  %v2456_v5 = vpop.f32.mrb[76].mxu1  ;;  %1952 = vxpose.xlu0.b32.cont [3/16] (narrow) %v1856_v52, 8 }
 0x23a   :  { %v2371_v30 = vpop.f32.mrb[73].mxu0  ;;  %v2457_v20 = vpop.f32.mrb[77].mxu1 }
 0x23b   :  { %v2372_v42 = vadd.f32 %v2371_v30, %v2370_v45  ;;  %v2458_v22 = vadd.f32 %v2457_v20, %v2456_v5  ;;  %v1863_v8 = vadd.f32 %v2449_v24, %v1654_v29 }
 0x23d   :  { %v1661_v4 = vadd.f32 %v2372_v42, %v4120_v47  ;;  %v2373_v33 = vpop.f32.mrb[74].mxu0  ;;  %v2459_v28 = vpop.f32.mrb[78].mxu1  ;;  %1953 = vxpose.xlu0.b32.cont [4/16] (narrow) %v1863_v8, 8 }
 0x23e   :  { %v2374_v56 = vpop.f32.mrb[75].mxu0  ;;  %v2460_v16 = vpop.f32.mrb[79].mxu1 }
 0x23f   :  { %v2375_v41 = vadd.f32 %v2374_v56, %v2373_v33  ;;  %v2461_v7 = vadd.f32 %v2460_v16, %v2459_v28  ;;  %v1870_v46 = vadd.f32 %v2452_v9, %v1661_v4 }
 0x241   :  { %v1668_v13 = vadd.f32 %v2375_v41, %v4123_v2  ;;  %v2376_v11 = vpop.f32.mrb[76].mxu0  ;;  %v2462_v12 = vpop.f32.mrb[80].mxu1  ;;  %1954 = vxpose.xlu0.b32.cont [5/16] (narrow) %v1870_v46, 8 }
 0x242   :  { %v2377_v0 = vpop.f32.mrb[77].mxu0  ;;  %v2463_v53 = vpop.f32.mrb[81].mxu1 }
 0x243   :  { %v2378_v14 = vadd.f32 %v2377_v0, %v2376_v11  ;;  %v2464_v49 = vadd.f32 %v2463_v53, %v2462_v12  ;;  %v1877_v39 = vadd.f32 %v2455_v61, %v1668_v13 }
 0x245   :  { %v1675_v47 = vadd.f32 %v2378_v14, %v4126_v59  ;;  %v2379_v63 = vpop.f32.mrb[78].mxu0  ;;  %v2465_v48 = vpop.f32.mrb[82].mxu1  ;;  %1955 = vxpose.xlu0.b32.cont [6/16] (narrow) %v1877_v39, 8 }
 0x246   :  { %v2380_v32 = vpop.f32.mrb[79].mxu0  ;;  %v2466_v43 = vpop.f32.mrb[83].mxu1 }
 0x247   :  { %v2381_v10 = vadd.f32 %v2380_v32, %v2379_v63  ;;  %v2467_v38 = vadd.f32 %v2466_v43, %v2465_v48  ;;  %v1884_v19 = vadd.f32 %v2458_v22, %v1675_v47 }
 0x249   :  { %v1682_v2 = vadd.f32 %v2381_v10, %v4129_v57  ;;  %v2382_v27 = vpop.f32.mrb[80].mxu0  ;;  %v2468_v62 = vpop.f32.mrb[84].mxu1  ;;  %1956 = vxpose.xlu0.b32.cont [7/16] (narrow) %v1884_v19, 8  ;;  %v1984_v19 = vlaneseq }
 0x24a   :  { %v2383_v23 = vpop.f32.mrb[81].mxu0  ;;  %v2469_v24 = vpop.f32.mrb[85].mxu1 }
 0x24b   :  { %v2384_v44 = vadd.f32 %v2383_v23, %v2382_v27  ;;  %v2470_v6 = vadd.f32 %v2469_v24, %v2468_v62  ;;  %v1891_v50 = vadd.f32 %v2461_v7, %v1682_v2 }
 0x24d   :  { %v1689_v59 = vadd.f32 %v2384_v44, %v4132_v58  ;;  %v2385_v25 = vpop.f32.mrb[82].mxu0  ;;  %v2471_v55 = vpop.f32.mrb[86].mxu1  ;;  %1957 = vxpose.xlu0.b32.cont [8/16] (narrow) %v1891_v50, 8 }
 0x24e   :  { %v2386_v34 = vpop.f32.mrb[83].mxu0  ;;  %v2472_v26 = vpop.f32.mrb[87].mxu1 }
 0x24f   :  { %v2387_v9 = vadd.f32 %v2386_v34, %v2385_v25  ;;  %v2473_v17 = vadd.f32 %v2472_v26, %v2471_v55  ;;  %v1898_v1 = vadd.f32 %v2464_v49, %v1689_v59 }
 0x251   :  { %v1696_v57 = vadd.f32 %v2387_v9, %v4135_v35  ;;  %v2388_v15 = vpop.f32.mrb[84].mxu0  ;;  %v2474_v40 = vpop.f32.mrb[88].mxu1  ;;  %1958 = vxpose.xlu0.b32.cont [9/16] (narrow) %v1898_v1, 8 }
 0x252   :  { %v2389_v3 = vpop.f32.mrb[85].mxu0  ;;  %v2475_v37 = vpop.f32.mrb[89].mxu1 }
 0x253   :  { %v2390_v51 = vadd.f32 %v2389_v3, %v2388_v15  ;;  %v2476_v61 = vadd.f32 %v2475_v37, %v2474_v40  ;;  %v1905_v52 = vadd.f32 %v2467_v38, %v1696_v57 }
 0x255   :  { %v1703_v58 = vadd.f32 %v2390_v51, %v4138_v54  ;;  %v2391_v29 = vpop.f32.mrb[86].mxu0  ;;  %v2477_v45 = vpop.f32.mrb[90].mxu1  ;;  %1959 = vxpose.xlu0.b32.cont [10/16] (narrow) %v1905_v52, 8 }
 0x256   :  { %v2392_v5 = vpop.f32.mrb[87].mxu0  ;;  %v2478_v30 = vpop.f32.mrb[91].mxu1 }
 0x257   :  { %v2393_v20 = vadd.f32 %v2392_v5, %v2391_v29  ;;  %v2479_v42 = vadd.f32 %v2478_v30, %v2477_v45  ;;  %v1912_v22 = vadd.f32 %v2470_v6, %v1703_v58 }
 0x259   :  { %v1710_v35 = vadd.f32 %v2393_v20, %v4141_v18  ;;  %v2394_v8 = vpop.f32.mrb[88].mxu0  ;;  %v2480_v4 = vpop.f32.mrb[92].mxu1  ;;  %1960 = vxpose.xlu0.b32.cont [11/16] (narrow) %v1912_v22, 8 }
 0x25a   :  { %v2395_v33 = vpop.f32.mrb[89].mxu0  ;;  %v2481_v28 = vpop.f32.mrb[93].mxu1 }
 0x25b   :  { %v2396_v56 = vadd.f32 %v2395_v33, %v2394_v8  ;;  %v2482_v16 = vadd.f32 %v2481_v28, %v2480_v4  ;;  %v1919_v41 = vadd.f32 %v2473_v17, %v1710_v35 }
 0x25d   :  { %v1717_v54 = vadd.f32 %v2396_v56, %v4144_v36  ;;  %v2397_v7 = vpop.f32.mrb[90].mxu0  ;;  %v2483_v46 = vpop.f32.mrb[94].mxu1  ;;  %1961 = vxpose.xlu0.b32.cont [12/16] (narrow) %v1919_v41, 8 }
 0x25e   :  { %v2398_v13 = vpop.f32.mrb[91].mxu0  ;;  %v2484_v11 = vpop.f32.mrb[95].mxu1 }
 0x25f   :  { %v2399_v12 = vadd.f32 %v2398_v13, %v2397_v7  ;;  %v2485_v0 = vadd.f32 %v2484_v11, %v2483_v46  ;;  %v1926_v53 = vadd.f32 %v2476_v61, %v1717_v54 }
 0x261   :  { %v1724_v18 = vadd.f32 %v2399_v12, %v4147_v21  ;;  %v2400_v14 = vpop.f32.mrb[92].mxu0  ;;  %1962 = vxpose.xlu0.b32.cont [13/16] (narrow) %v1926_v53, 8  ;;  %v1985_v21 = vshrl.u32 %v1984_v19, 7 }
 0x262   :  { %v2401_v49 = vpop.f32.mrb[93].mxu0 }
 0x263   :  { %v2402_v39 = vadd.f32 %v2401_v49, %v2400_v14  ;;  %v1933_v47 = vadd.f32 %v2479_v42, %v1724_v18  ;;  %v1986_v27 = vsub.s32 0, %v1985_v21 }
 0x265   :  { %v1731_v63 = vadd.f32 %v2402_v39, %v4150_v60  ;;  %v2403_v48 = vpop.f32.mrb[94].mxu0  ;;  %1963 = vxpose.xlu0.b32.cont [14/16] (narrow) %v1933_v47, 8 }
 0x266   :  { %v2404_v36 = vpop.f32.mrb[95].mxu0 }
 0x267   :  { %v2405_v32 = vadd.f32 %v2404_v36, %v2403_v48  ;;  %v1940_v43 = vadd.f32 %v2482_v16, %v1731_v63 }
 0x269   :  { %v1738_v10 = vadd.f32 %v2405_v32, %v4153_v31  ;;  %1964 = vxpose.xlu0.b32.cont [15/16] (narrow) %v1940_v43, 8 }
 0x26b   :  { %v1947_v38 = vadd.f32 %v2485_v0, %v1738_v10 }
 0x26d   :  { %1965 = vxpose.xlu0.b32.end [16/16] (narrow) %v1947_v38, 8 }
 0x2b1   :  { %v1966_v2 = vpop.trf.xlu0 }
 0x2b2   :  { %2749 = vrcp.f32 %v1966_v2 }
 0x2bc   :  { %v2750_v62 = vpop.eup %2749 }
 0x2bd   :  { %v1987_v23 = vrot.slane %v2750_v62, %v1986_v27 }
 0x2bf   :  { %v1988_v60 = vmul.f32 %v1987_v23, %v1966_v2 }
 0x2c1   :  { %1989 = vst [vmem:[#allocation7 - $0x1] sm:$0x6] %v1988_v60 }
 0x2c2   :  { %2810 = shalt.err (!%p2807_p6)
}
 0x2c3   :  { %s2811_s12 = scalar_lea.hbm %s4185_s2, 32 }
 0x2c4   :  { %p2812_p7 = scmp.ne.s32.totalorder %s4185_s2, %s2811_s12  ;;  %p2815_p8 = scmp.lt.u32.totalorder %s2811_s12, %s4185_s2 }
 0x2c6   :  { %p2817_p9 = pnand %p2815_p8, %p2812_p7 }
 0x2c8   :  { %2820 = shalt.err (!%p2817_p9)
}
 0x2c9   :  { %1999 = dma.vmem_to_hbm [thread:$0]  %s1997_s8, 32, %s4185_s2, [#allocation4]  }
 0x2ca   :  { %2825 = dma.done.wait [#allocation4], 32  }
 0x2cb   :  { %2826 = vsyncadd [#allocation4], 4294967264 }
 0x2cc   :  { %2003 = vsyncpa [#allocation3], 1 }
 0x2cd   :  { %2004 = vsyncpa [#allocation6], 1 }
 0x2ce   :  { %2005 = vsyncpa [#allocation4], 1 }

</bundles_post_ra>
